<compile_context>
chip_gen: v5e
topology: v5e:2x2
jax: 0.10.0
libtpu: 0.0.40
codegen_flags: <defaults>
</compile_context>

<pallas_src>
import jax
import jax.numpy as jnp
from jax.experimental import pallas as pl
from jax.experimental.pallas import tpu as pltpu

LABELS = 18            # train_label_shape
B = 2                  # batch


def _round_up(x, m):
    return ((x + m - 1) // m) * m


# -----------------------------------------------------------------------------
# Generation detection: VMEM capacity drives both the VMEM budget and the
# single-vs-dual TensorCore heuristic (v7x: 64 MiB/TC, 2 TCs; v5e/v6e: 128 MiB,
# 1 TC).  Falls back to the conservative (v7x-safe) settings.
# -----------------------------------------------------------------------------
def _detect_tpu():
    vmem = 64 * 1024 * 1024
    try:
        info = pltpu.get_tpu_info()
        vmem = int(getattr(info, "vmem_capacity_bytes", vmem))
    except Exception:
        pass
    dual_tc = vmem <= 96 * 1024 * 1024
    return vmem, dual_tc


_VMEM_BYTES, _DUAL_TC = _detect_tpu()
VMEM_LIMIT = min(_VMEM_BYTES * 3 // 4, 100 * 1024 * 1024)
_TILE_BUDGET = int(VMEM_LIMIT * 0.70)

# K for the three convs is 27648 / 18432 / 9216 = 9216 * {3,2,1}; these
# candidates all divide at least one of them, 128 divides all.
_TK_CANDIDATES = (9216, 4608, 3072, 2304, 1536, 1152, 768, 512, 384, 256, 128)


def _sub_k(tk):
    # Dequant sub-chunk: bounds the int8->bf16 VMEM temp to sub_k*tn*2 bytes.
    for s in (1152, 1024, 512, 256, 128):
        if tk % s == 0:
            return s
    return tk


def _pick_tk(K, tm, tn, bias_rows):
    for tk in _TK_CANDIDATES:
        if tk > K or K % tk:
            continue
        sk = _sub_k(tk)
        est = (2 * tm * tk * 2          # A (bf16), double-buffered
               + 2 * tk * tn * 1        # B (int8), double-buffered
               + sk * tn * 2            # dequantized bf16 sub-tile
               + 2 * tm * tn * 2        # output (bf16), double-buffered
               + tm * tn * 4            # f32 accumulator scratch
               + 2 * bias_rows * tn * 4 # bias
               + 2 * tn * 4)            # per-channel scale
        if est <= _TILE_BUDGET:
            return tk
    return 128


# -----------------------------------------------------------------------------
# int8 weight quantization (per output channel) + [gn, K, N/gn] packing so each
# (tk, tn) weight tile is a contiguous HBM chunk.
# -----------------------------------------------------------------------------
def _quantize_int8(w):  # w: (K, N) f32
    amax = jnp.max(jnp.abs(w), axis=0)
    scale = jnp.maximum(amax, 1e-6) / 127.0
    q = jnp.clip(jnp.round(w / scale[None, :]), -127.0, 127.0).astype(jnp.int8)
    return q, scale.astype(jnp.float32)


def pack_conv_weight(w_f32, dual_tc=_DUAL_TC):
    K, N = w_f32.shape
    gn = 2 if (dual_tc and N % 256 == 0) else 1
    tn = N // gn
    q, scale = _quantize_int8(w_f32)
    wq = q.reshape(K, gn, tn).transpose(1, 0, 2)        # (gn, K, tn)
    sc = scale.reshape(gn, 1, tn) if gn > 1 else scale.reshape(1, 1, tn)
    return wq, sc


# -----------------------------------------------------------------------------
# Tiled conv-as-matmul kernel: bf16 im2col activations x int8 weights
# (dequantized to bf16 in sub-K chunks), f32 accumulation, per-channel scale +
# bias (+ optional ReLU) epilogue, bf16 output.
# -----------------------------------------------------------------------------
def conv_matmul(a, wq, sc, bias, act=None, out_dtype=jnp.bfloat16):
    a = a.astype(jnp.bfloat16)
    M, K = a.shape
    gn, K2, tn = wq.shape
    assert K == K2
    N = gn * tn

    tm = _round_up(M, 8)                    # single M block (M = B*49 is tiny)
    brows = tm if bias.ndim == 2 else 1
    tk = _pick_tk(K, tm, tn, brows)
    sub_k = _sub_k(tk)
    n_sub = tk // sub_k
    gk = K // tk

    a_p = a if tm == M else jnp.pad(a, ((0, tm - M), (0, 0)))
    if bias.ndim == 2:                      # per-pixel bias map (folded conv0)
        bias_f = bias.astype(jnp.float32)
        if tm != M:
            bias_f = jnp.pad(bias_f, ((0, tm - M), (0, 0)))
        bias_p = bias_f.reshape(tm, gn, tn).transpose(1, 0, 2)   # (gn, tm, tn)
    else:                                   # per-channel bias
        bias_p = bias.astype(jnp.float32).reshape(gn, 1, tn)

    def kernel(a_ref, b_ref, s_ref, bias_ref, o_ref, acc_ref):
        @pl.when(pl.program_id(2) == 0)
        def _():
            acc_ref[...] = jnp.zeros_like(acc_ref)

        acc = acc_ref[...]
        for c in range(n_sub):              # dequant int8->bf16 in sub-K chunks
            lo = c * sub_k
            acc = acc + jnp.dot(
                a_ref[:, lo:lo + sub_k],
                b_ref[lo:lo + sub_k, :].astype(jnp.bfloat16),
                preferred_element_type=jnp.float32)
        acc_ref[...] = acc

        @pl.when(pl.program_id(2) == pl.num_programs(2) - 1)
        def _():
            r = acc_ref[...] * s_ref[...] + bias_ref[...]
            if act == "relu":
                r = jnp.maximum(r, 0.0)
            o_ref[...] = r.astype(o_ref.dtype)

    out = pl.pallas_call(
        kernel,
        out_shape=jax.ShapeDtypeStruct((tm, N), out_dtype),
        grid_spec=pltpu.PrefetchScalarGridSpec(
            num_scalar_prefetch=0,
            grid=(1, gn, gk),
            in_specs=[
                pl.BlockSpec((tm, tk), lambda i, j, k: (i, k)),
                pl.BlockSpec((None, tk, tn), lambda i, j, k: (j, k, 0)),
                pl.BlockSpec((None, 1, tn), lambda i, j, k: (j, 0, 0)),
                pl.BlockSpec((None, brows, tn), lambda i, j, k: (j, 0, 0)),
            ],
            out_specs=pl.BlockSpec((tm, tn), lambda i, j, k: (i, j)),
            scratch_shapes=[pltpu.VMEM((tm, tn), jnp.float32)],
        ),
        compiler_params=pltpu.CompilerParams(
            dimension_semantics=("parallel", "parallel", "arbitrary"),
            vmem_limit_bytes=VMEM_LIMIT,
        ),
    )(a_p, wq, sc, bias_p)
    return out[:M, :]


# -----------------------------------------------------------------------------
# Dense branch: SE gate (x * attention(x)).  One grid step per batch element.
# (conv_extrapolator is folded into conv0, so this kernel only gates.)
# -----------------------------------------------------------------------------
def _se_gate_kernel(x_ref, w1_ref, w2_ref, o_ref):
    xf = x_ref[0].astype(jnp.float32)                        # (HW, C)
    pooled = jnp.mean(xf, axis=0, keepdims=True)             # AdaptiveAvgPool2d(1)
    h = jnp.maximum(jnp.dot(pooled.astype(jnp.bfloat16), w1_ref[...],
                            preferred_element_type=jnp.float32), 0.0)
    g = jax.nn.sigmoid(jnp.dot(h.astype(jnp.bfloat16), w2_ref[...],
                               preferred_element_type=jnp.float32))  # (1, C)
    o_ref[0] = (xf * g).astype(o_ref.dtype)


def se_gate(x, w1, w2):
    Bn, HW, C = x.shape
    Cr = w1.shape[1]
    return pl.pallas_call(
        _se_gate_kernel,
        out_shape=jax.ShapeDtypeStruct((Bn, HW, C), jnp.bfloat16),
        grid_spec=pltpu.PrefetchScalarGridSpec(
            num_scalar_prefetch=0, grid=(Bn,),
            in_specs=[
                pl.BlockSpec((1, HW, C), lambda b: (b, 0, 0)),
                pl.BlockSpec((C, Cr), lambda b: (0, 0)),
                pl.BlockSpec((Cr, C), lambda b: (0, 0)),
            ],
            out_specs=pl.BlockSpec((1, HW, C), lambda b: (b, 0, 0)),
        ),
        compiler_params=pltpu.CompilerParams(
            dimension_semantics=("parallel",),
            vmem_limit_bytes=VMEM_LIMIT,
        ),
    )(x, w1, w2)


# -----------------------------------------------------------------------------
# ResNet branch: SE gate + bilinear resize (16x16 -> 7x7, align_corners=False)
# fused.  The resize is a [49, 256] interpolation operator applied by a bf16
# MXU matmul.
# -----------------------------------------------------------------------------
def _se_interp_kernel(x_ref, w1_ref, w2_ref, m_ref, o_ref):
    xf = x_ref[0].astype(jnp.float32)                        # (HWin, C)
    pooled = jnp.mean(xf, axis=0, keepdims=True)
    h = jnp.maximum(jnp.dot(pooled.astype(jnp.bfloat16), w1_ref[...],
                            preferred_element_type=jnp.float32), 0.0)
    g = jax.nn.sigmoid(jnp.dot(h.astype(jnp.bfloat16), w2_ref[...],
                               preferred_element_type=jnp.float32))
    gated = (xf * g).astype(jnp.bfloat16)                    # x * attention(x)
    o_ref[0] = jnp.dot(m_ref[...], gated,
                       preferred_element_type=jnp.float32).astype(o_ref.dtype)


def se_gate_interp(x, w1, w2, m):
    Bn, HWin, C = x.shape
    Cr = w1.shape[1]
    HWout = m.shape[0]
    return pl.pallas_call(
        _se_interp_kernel,
        out_shape=jax.ShapeDtypeStruct((Bn, HWout, C), jnp.bfloat16),
        grid_spec=pltpu.PrefetchScalarGridSpec(
            num_scalar_prefetch=0, grid=(Bn,),
            in_specs=[
                pl.BlockSpec((1, HWin, C), lambda b: (b, 0, 0)),
                pl.BlockSpec((C, Cr), lambda b: (0, 0)),
                pl.BlockSpec((Cr, C), lambda b: (0, 0)),
                pl.BlockSpec((HWout, HWin), lambda b: (0, 0)),
            ],
            out_specs=pl.BlockSpec((1, HWout, C), lambda b: (b, 0, 0)),
        ),
        compiler_params=pltpu.CompilerParams(
            dimension_semantics=("parallel",),
            vmem_limit_bytes=VMEM_LIMIT,
        ),
    )(x, w1, w2, m)


# -----------------------------------------------------------------------------
# Head: conv3 (1x1, 512->18) + ReLU + AdaptiveAvgPool2d((1,1)) + Flatten +
# Linear(18,18) + Softmax(dim=1), all fused in one tiny kernel.
# Per-batch average pooling is expressed as a (B, B*HW) averaging matrix P.
# -----------------------------------------------------------------------------
def _head_kernel(x_ref, w3_ref, b3_ref, p_ref, wc_ref, bc_ref, o_ref):
    y = jnp.dot(x_ref[...], w3_ref[...],
                preferred_element_type=jnp.float32) + b3_ref[...]   # (B*HW, L)
    y = jnp.maximum(y, 0.0)                                         # relu3
    pooled = jnp.dot(p_ref[...], y,
                     preferred_element_type=jnp.float32)            # (B, L) avgpool
    logits = jnp.dot(pooled, wc_ref[...],
                     preferred_element_type=jnp.float32) + bc_ref[...]
    mx = jnp.max(logits, axis=1, keepdims=True)
    e = jnp.exp(logits - mx)
    o_ref[...] = (e / jnp.sum(e, axis=1, keepdims=True)).astype(o_ref.dtype)


def head(x, Bn, w3, b3, wc, bc):
    Mrows, _ = x.shape
    HW = Mrows // Bn
    rows = jnp.arange(Mrows) // HW
    P = (rows[None, :] == jnp.arange(Bn)[:, None]).astype(jnp.float32) / HW
    L = w3.shape[1]
    return pl.pallas_call(
        _head_kernel,
        out_shape=jax.ShapeDtypeStruct((Bn, L), jnp.float32),
    )(x, w3, b3.reshape(1, L), P, wc, bc.reshape(1, L))


# -----------------------------------------------------------------------------
# Glue: im2col for 3x3/pad=1 convs (bf16), bilinear interpolation matrix, params.
# -----------------------------------------------------------------------------
def im2col_3x3(x):  # x: (B, H, W, C) -> (B*H*W, 9*C), patch order (kh, kw, C)
    Bn, H, W, C = x.shape
    xp = jnp.pad(x, ((0, 0), (1, 1), (1, 1), (0, 0)))
    patches = [xp[:, kh:kh + H, kw:kw + W, :] for kh in range(3) for kw in range(3)]
    return jnp.stack(patches, axis=3).reshape(Bn * H * W, 9 * C)


def bilinear_matrix(in_size, out_size):
    # PyTorch F.interpolate(mode='bilinear', align_corners=False) coordinates
    scale = in_size / out_size
    src = (jnp.arange(out_size, dtype=jnp.float32) + 0.5) * scale - 0.5
    src = jnp.clip(src, 0.0, in_size - 1.0)
    lo = jnp.floor(src).astype(jnp.int32)
    hi = jnp.minimum(lo + 1, in_size - 1)
    frac = src - lo.astype(jnp.float32)
    A = jnp.zeros((out_size, in_size), jnp.float32)
    A = A.at[jnp.arange(out_size), lo].add(1.0 - frac)
    A = A.at[jnp.arange(out_size), hi].add(frac)
    return A


def init_params(key):
    ks = jax.random.split(key, 16)

    def nrm(k, shape, fan_in):
        return jax.random.normal(k, shape, jnp.float32) / jnp.sqrt(fan_in)

    def bini(k, n):
        return 0.01 * jax.random.normal(k, (n,), jnp.float32)

    p = {}
    # SE attention ('se', reduction=8; Linear layers bias-free as in SELayer)
    p["se_d_w1"] = nrm(ks[0], (1024, 128), 1024).astype(jnp.bfloat16)
    p["se_d_w2"] = nrm(ks[1], (128, 1024), 128).astype(jnp.bfloat16)
    p["se_r_w1"] = nrm(ks[2], (2048, 256), 2048).astype(jnp.bfloat16)
    p["se_r_w2"] = nrm(ks[3], (256, 2048), 256).astype(jnp.bfloat16)

    # conv_extrapolator: Conv2d(1024, 2048, kernel_size=1) (f32 masters, folded)
    ext_w = nrm(ks[4], (1024, 2048), 1024)
    ext_b = bini(ks[5], 2048)

    # conv0: Conv2d(4096, 2048, 3, padding=1)   (num_init_features == 4096)
    w0_taps = nrm(ks[6], (9, 4096, 2048), 9 * 4096)   # tap-major HWIO
    b0 = bini(ks[7], 2048)

    # Exact fold of conv_extrapolator into conv0 (no nonlinearity in between):
    #   dense-part weight per tap:  ext_w @ W0_tap[:2048]
    #   bias: b0 + sum over *in-bounds* taps of ext_b @ W0_tap[:2048]
    # (out-of-bounds taps see the zero padding of the fused map, so the ext bias
    #  contribution must be masked per output pixel -> per-pixel bias map.)
    w0_dense = jnp.einsum("ce,teo->tco", ext_w, w0_taps[:, :2048, :])   # (9,1024,2048)
    w0_folded = jnp.concatenate([w0_dense, w0_taps[:, 2048:, :]], axis=1)  # (9,3072,2048)
    c_taps = jnp.einsum("e,teo->to", ext_b, w0_taps[:, :2048, :])       # (9,2048)
    idx = jnp.arange(7)
    rows = []
    for kh in range(3):
        vh = ((idx + kh - 1) >= 0) & ((idx + kh - 1) < 7)
        for kw in range(3):
            vw = ((idx + kw - 1) >= 0) & ((idx + kw - 1) < 7)
            rows.append((vh[:, None] & vw[None, :]).reshape(49))
    mask = jnp.stack(rows, 0).astype(jnp.float32)                        # (9, 49)
    p["bias0_map"] = b0[None, :] + mask.T @ c_taps                       # (49, 2048)
    p["w0_q"], p["s0"] = pack_conv_weight(w0_folded.reshape(9 * 3072, 2048))

    # conv1: Conv2d(2048, 1024, 3, padding=1)
    p["w1_q"], p["s1"] = pack_conv_weight(nrm(ks[8], (9 * 2048, 1024), 9 * 2048))
    p["b1"] = bini(ks[9], 1024)
    # conv2: Conv2d(1024, 512, 3, padding=1)
    p["w2_q"], p["s2"] = pack_conv_weight(nrm(ks[10], (9 * 1024, 512), 9 * 1024))
    p["b2"] = bini(ks[11], 512)
    # conv3: Conv2d(512, LABELS, kernel_size=1)
    p["w3"] = nrm(ks[12], (512, LABELS), 512).astype(jnp.bfloat16)
    p["b3"] = bini(ks[13], LABELS)
    # classifier: Linear(LABELS, LABELS) — kept f32 (tiny; exact softmax head)
    p["wc"] = nrm(ks[14], (LABELS, LABELS), LABELS)
    p["bc"] = bini(ks[15], LABELS)
    # bilinear interpolation matrix (16x16 -> 7x7) as a [49, 256] operator (bf16)
    A = bilinear_matrix(16, 7)
    p["interp"] = jnp.einsum("ih,jw->ijhw", A, A).reshape(49, 256).astype(jnp.bfloat16)
    return p


# -----------------------------------------------------------------------------
# Full FusionModel forward (post-backbone).
# -----------------------------------------------------------------------------
def fusion_model_forward(params, dense_features, res_features):
    Bn = dense_features.shape[0]
    d = dense_features.reshape(Bn, 7 * 7, 1024).astype(jnp.bfloat16)
    r = res_features.reshape(Bn, 16 * 16, 2048).astype(jnp.bfloat16)

    # --- dense branch: x * Attention('se')(x) (ext conv folded into conv0) ---
    d_g = se_gate(d, params["se_d_w1"], params["se_d_w2"])               # (B,49,1024)
    # --- resnet branch: x * Attention('se')(x), fused with bilinear 16->7 ---
    r7 = se_gate_interp(r, params["se_r_w1"], params["se_r_w2"],
                        params["interp"])                                # (B,49,2048)

    # --- fuse_features ('concat'): dense-gated (pre-ext) + resnet -> 3072 ch ---
    fused = jnp.concatenate([d_g, r7], axis=-1).reshape(Bn, 7, 7, 3072)

    # --- conv0 (no ReLU), with per-pixel bias map from the ext fold ---
    bias0 = jnp.tile(params["bias0_map"], (Bn, 1))                       # (B*49, 2048)
    x = conv_matmul(im2col_3x3(fused), params["w0_q"], params["s0"], bias0
                    ).reshape(Bn, 7, 7, 2048)
    # --- conv1 + relu1, conv2 + relu2 ---
    x = conv_matmul(im2col_3x3(x), params["w1_q"], params["s1"], params["b1"],
                    act="relu").reshape(Bn, 7, 7, 1024)
    x = conv_matmul(im2col_3x3(x), params["w2_q"], params["s2"], params["b2"],
                    act="relu")                                          # (B*49, 512)
    # --- conv3 (1x1) + relu3 + avgpool + flatten + classifier + softmax ---
    return head(x, Bn, params["w3"], params["b3"], params["wc"], params["bc"])


if __name__ == "__main__":
    key = jax.random.PRNGKey(0)
    kp, kd, kr = jax.random.split(key, 3)
    params = init_params(kp)
    # Backbone output feature maps (see TODO(synk) at top): NHWC
    dense_features = jax.random.normal(kd, (B, 7, 7, 1024), jnp.float32)
    res_features = jax.random.normal(kr, (B, 16, 16, 2048), jnp.float32)

    out = jax.jit(fusion_model_forward)(params, dense_features, res_features)
    out = jax.block_until_ready(out)
    assert out.shape == (B, LABELS)
    assert bool(jnp.all(jnp.isfinite(out)))
    print("KERNEL_OK")
</pallas_src>

<mosaic_0001>
module attributes {stable_mosaic.version = 11 : i64} {
  func.func @_se_interp_kernel(%arg0: i32, %arg1: memref<1x256x2048xbf16, #tpu.memory_space<vmem>>, %arg2: memref<2048x256xbf16, #tpu.memory_space<vmem>>, %arg3: memref<256x2048xbf16, #tpu.memory_space<vmem>>, %arg4: memref<49x256xbf16, #tpu.memory_space<vmem>>, %arg5: memref<1x49x2048xbf16, #tpu.memory_space<vmem>>) attributes {dimension_semantics = [#tpu.dimension_semantics<parallel>], iteration_bounds = array<i64: 2>, scalar_prefetch = 0 : i64, scratch_operands = 0 : i64, tpu.core_type = #tpu.core_type<tc>, window_params = [{transform_indices = @transform_0, window_bounds = array<i64: 1, 256, 2048>}, {pipeline_mode = #tpu.pipeline_mode<synchronous>, transform_indices = @transform_1, window_bounds = array<i64: 2048, 256>}, {pipeline_mode = #tpu.pipeline_mode<synchronous>, transform_indices = @transform_2, window_bounds = array<i64: 256, 2048>}, {pipeline_mode = #tpu.pipeline_mode<synchronous>, transform_indices = @transform_3, window_bounds = array<i64: 49, 256>}, {transform_indices = @transform_4, window_bounds = array<i64: 1, 49, 2048>}]} {
    %c0 = arith.constant 0 : index
    %c0_0 = arith.constant 0 : index
    %c0_1 = arith.constant 0 : index
    %0 = vector.load %arg1[%c0, %c0_0, %c0_1] : memref<1x256x2048xbf16, #tpu.memory_space<vmem>>, vector<1x256x2048xbf16>
    %1 = vector.shape_cast %0 : vector<1x256x2048xbf16> to vector<256x2048xbf16>
    %2 = arith.extf %1 : vector<256x2048xbf16> to vector<256x2048xf32>
    %cst = arith.constant dense<0.000000e+00> : vector<2048xf32>
    %3 = vector.multi_reduction <add>, %2, %cst [0] : vector<256x2048xf32> to vector<2048xf32>
    %4 = vector.shape_cast %3 : vector<2048xf32> to vector<1x2048xf32>
    %cst_2 = arith.constant 2.560000e+02 : f32
    %5 = vector.broadcast %cst_2 : f32 to vector<1x2048xf32>
    %6 = arith.divf %4, %5 : vector<1x2048xf32>
    %7 = arith.truncf %6 : vector<1x2048xf32> to vector<1x2048xbf16>
    %c0_3 = arith.constant 0 : index
    %c0_4 = arith.constant 0 : index
    %8 = vector.load %arg2[%c0_3, %c0_4] : memref<2048x256xbf16, #tpu.memory_space<vmem>>, vector<2048x256xbf16>
    %cst_5 = arith.constant dense<0.000000e+00> : vector<1x256xf32>
    %9 = tpu.matmul %7, %8, %cst_5 {dimension_numbers = #tpu.dot_dimension_numbers<[1], [0], [0], [1], [0, 0, 1, 1], [], []>} : vector<1x2048xbf16>, vector<2048x256xbf16>, vector<1x256xf32> -> vector<1x256xf32>
    %cst_6 = arith.constant 0.000000e+00 : f32
    %10 = vector.broadcast %cst_6 : f32 to vector<1x256xf32>
    %11 = arith.maximumf %9, %10 : vector<1x256xf32>
    %12 = arith.truncf %11 : vector<1x256xf32> to vector<1x256xbf16>
    %c0_7 = arith.constant 0 : index
    %c0_8 = arith.constant 0 : index
    %13 = vector.load %arg3[%c0_7, %c0_8] : memref<256x2048xbf16, #tpu.memory_space<vmem>>, vector<256x2048xbf16>
    %cst_9 = arith.constant dense<0.000000e+00> : vector<1x2048xf32>
    %14 = tpu.matmul %12, %13, %cst_9 {dimension_numbers = #tpu.dot_dimension_numbers<[1], [0], [0], [1], [0, 0, 1, 1], [], []>} : vector<1x256xbf16>, vector<256x2048xbf16>, vector<1x2048xf32> -> vector<1x2048xf32>
    %15 = arith.negf %14 : vector<1x2048xf32>
    %16 = math.exp %15 : vector<1x2048xf32>
    %cst_10 = arith.constant 1.000000e+00 : f32
    %17 = vector.broadcast %cst_10 : f32 to vector<1x2048xf32>
    %18 = arith.addf %17, %16 : vector<1x2048xf32>
    %19 = arith.divf %17, %18 : vector<1x2048xf32>
    %20 = vector.broadcast %19 : vector<1x2048xf32> to vector<256x2048xf32>
    %21 = arith.mulf %2, %20 : vector<256x2048xf32>
    %22 = arith.truncf %21 : vector<256x2048xf32> to vector<256x2048xbf16>
    %c0_11 = arith.constant 0 : index
    %c0_12 = arith.constant 0 : index
    %23 = vector.load %arg4[%c0_11, %c0_12] : memref<49x256xbf16, #tpu.memory_space<vmem>>, vector<49x256xbf16>
    %cst_13 = arith.constant dense<0.000000e+00> : vector<49x2048xf32>
    %24 = tpu.matmul %23, %22, %cst_13 {dimension_numbers = #tpu.dot_dimension_numbers<[1], [0], [0], [1], [0, 0, 1, 1], [], []>} : vector<49x256xbf16>, vector<256x2048xbf16>, vector<49x2048xf32> -> vector<49x2048xf32>
    %25 = arith.truncf %24 : vector<49x2048xf32> to vector<49x2048xbf16>
    %c0_14 = arith.constant 0 : index
    %c0_15 = arith.constant 0 : index
    %c0_16 = arith.constant 0 : index
    %26 = vector.load %arg5[%c0_14, %c0_15, %c0_16] : memref<1x49x2048xbf16, #tpu.memory_space<vmem>>, vector<1x49x2048xbf16>
    %27 = vector.shape_cast %26 : vector<1x49x2048xbf16> to vector<49x2048xbf16>
    %28 = vector.shape_cast %25 : vector<49x2048xbf16> to vector<1x49x2048xbf16>
    tpu.vector_store %arg5[%c0_14, %c0_15, %c0_16], %28 {strides = array<i32>} : memref<1x49x2048xbf16, #tpu.memory_space<vmem>>, vector<1x49x2048xbf16>,
    return
  }
  func.func @transform_0(%arg0: i32) -> (i32, i32, i32) {
    %c0_i32 = arith.constant 0 : i32
    %c0_i32_0 = arith.constant 0 : i32
    %c0_i32_1 = arith.constant 0 : i32
    return %arg0, %c0_i32, %c0_i32_0 : i32, i32, i32
  }
  func.func @transform_1(%arg0: i32) -> (i32, i32) {
    %c0_i32 = arith.constant 0 : i32
    %c0_i32_0 = arith.constant 0 : i32
    %c0_i32_1 = arith.constant 0 : i32
    return %c0_i32, %c0_i32_0 : i32, i32
  }
  func.func @transform_2(%arg0: i32) -> (i32, i32) {
    %c0_i32 = arith.constant 0 : i32
    %c0_i32_0 = arith.constant 0 : i32
    %c0_i32_1 = arith.constant 0 : i32
    return %c0_i32, %c0_i32_0 : i32, i32
  }
  func.func @transform_3(%arg0: i32) -> (i32, i32) {
    %c0_i32 = arith.constant 0 : i32
    %c0_i32_0 = arith.constant 0 : i32
    %c0_i32_1 = arith.constant 0 : i32
    return %c0_i32, %c0_i32_0 : i32, i32
  }
  func.func @transform_4(%arg0: i32) -> (i32, i32, i32) {
    %c0_i32 = arith.constant 0 : i32
    %c0_i32_0 = arith.constant 0 : i32
    %c0_i32_1 = arith.constant 0 : i32
    return %arg0, %c0_i32, %c0_i32_0 : i32, i32, i32
  }
}

module attributes {stable_mosaic.version = 11 : i64} {
  func.func @_se_gate_kernel(%arg0: i32, %arg1: memref<1x49x1024xbf16, #tpu.memory_space<vmem>>, %arg2: memref<1024x128xbf16, #tpu.memory_space<vmem>>, %arg3: memref<128x1024xbf16, #tpu.memory_space<vmem>>, %arg4: memref<1x49x1024xbf16, #tpu.memory_space<vmem>>) attributes {dimension_semantics = [#tpu.dimension_semantics<parallel>], iteration_bounds = array<i64: 2>, scalar_prefetch = 0 : i64, scratch_operands = 0 : i64, tpu.core_type = #tpu.core_type<tc>, window_params = [{transform_indices = @transform_0, window_bounds = array<i64: 1, 49, 1024>}, {pipeline_mode = #tpu.pipeline_mode<synchronous>, transform_indices = @transform_1, window_bounds = array<i64: 1024, 128>}, {pipeline_mode = #tpu.pipeline_mode<synchronous>, transform_indices = @transform_2, window_bounds = array<i64: 128, 1024>}, {transform_indices = @transform_3, window_bounds = array<i64: 1, 49, 1024>}]} {
    %c0 = arith.constant 0 : index
    %c0_0 = arith.constant 0 : index
    %c0_1 = arith.constant 0 : index
    %0 = vector.load %arg1[%c0, %c0_0, %c0_1] : memref<1x49x1024xbf16, #tpu.memory_space<vmem>>, vector<1x49x1024xbf16>
    %1 = vector.shape_cast %0 : vector<1x49x1024xbf16> to vector<49x1024xbf16>
    %2 = arith.extf %1 : vector<49x1024xbf16> to vector<49x1024xf32>
    %cst = arith.constant dense<0.000000e+00> : vector<1024xf32>
    %3 = vector.multi_reduction <add>, %2, %cst [0] : vector<49x1024xf32> to vector<1024xf32>
    %4 = vector.shape_cast %3 : vector<1024xf32> to vector<1x1024xf32>
    %cst_2 = arith.constant 4.900000e+01 : f32
    %5 = vector.broadcast %cst_2 : f32 to vector<1x1024xf32>
    %6 = arith.divf %4, %5 : vector<1x1024xf32>
    %7 = arith.truncf %6 : vector<1x1024xf32> to vector<1x1024xbf16>
    %c0_3 = arith.constant 0 : index
    %c0_4 = arith.constant 0 : index
    %8 = vector.load %arg2[%c0_3, %c0_4] : memref<1024x128xbf16, #tpu.memory_space<vmem>>, vector<1024x128xbf16>
    %cst_5 = arith.constant dense<0.000000e+00> : vector<1x128xf32>
    %9 = tpu.matmul %7, %8, %cst_5 {dimension_numbers = #tpu.dot_dimension_numbers<[1], [0], [0], [1], [0, 0, 1, 1], [], []>} : vector<1x1024xbf16>, vector<1024x128xbf16>, vector<1x128xf32> -> vector<1x128xf32>
    %cst_6 = arith.constant 0.000000e+00 : f32
    %10 = vector.broadcast %cst_6 : f32 to vector<1x128xf32>
    %11 = arith.maximumf %9, %10 : vector<1x128xf32>
    %12 = arith.truncf %11 : vector<1x128xf32> to vector<1x128xbf16>
    %c0_7 = arith.constant 0 : index
    %c0_8 = arith.constant 0 : index
    %13 = vector.load %arg3[%c0_7, %c0_8] : memref<128x1024xbf16, #tpu.memory_space<vmem>>, vector<128x1024xbf16>
    %cst_9 = arith.constant dense<0.000000e+00> : vector<1x1024xf32>
    %14 = tpu.matmul %12, %13, %cst_9 {dimension_numbers = #tpu.dot_dimension_numbers<[1], [0], [0], [1], [0, 0, 1, 1], [], []>} : vector<1x128xbf16>, vector<128x1024xbf16>, vector<1x1024xf32> -> vector<1x1024xf32>
    %15 = arith.negf %14 : vector<1x1024xf32>
    %16 = math.exp %15 : vector<1x1024xf32>
    %cst_10 = arith.constant 1.000000e+00 : f32
    %17 = vector.broadcast %cst_10 : f32 to vector<1x1024xf32>
    %18 = arith.addf %17, %16 : vector<1x1024xf32>
    %19 = arith.divf %17, %18 : vector<1x1024xf32>
    %20 = vector.broadcast %19 : vector<1x1024xf32> to vector<49x1024xf32>
    %21 = arith.mulf %2, %20 : vector<49x1024xf32>
    %22 = arith.truncf %21 : vector<49x1024xf32> to vector<49x1024xbf16>
    %c0_11 = arith.constant 0 : index
    %c0_12 = arith.constant 0 : index
    %c0_13 = arith.constant 0 : index
    %23 = vector.load %arg4[%c0_11, %c0_12, %c0_13] : memref<1x49x1024xbf16, #tpu.memory_space<vmem>>, vector<1x49x1024xbf16>
    %24 = vector.shape_cast %23 : vector<1x49x1024xbf16> to vector<49x1024xbf16>
    %25 = vector.shape_cast %22 : vector<49x1024xbf16> to vector<1x49x1024xbf16>
    tpu.vector_store %arg4[%c0_11, %c0_12, %c0_13], %25 {strides = array<i32>} : memref<1x49x1024xbf16, #tpu.memory_space<vmem>>, vector<1x49x1024xbf16>,
    return
  }
  func.func @transform_0(%arg0: i32) -> (i32, i32, i32) {
    %c0_i32 = arith.constant 0 : i32
    %c0_i32_0 = arith.constant 0 : i32
    %c0_i32_1 = arith.constant 0 : i32
    return %arg0, %c0_i32, %c0_i32_0 : i32, i32, i32
  }
  func.func @transform_1(%arg0: i32) -> (i32, i32) {
    %c0_i32 = arith.constant 0 : i32
    %c0_i32_0 = arith.constant 0 : i32
    %c0_i32_1 = arith.constant 0 : i32
    return %c0_i32, %c0_i32_0 : i32, i32
  }
  func.func @transform_2(%arg0: i32) -> (i32, i32) {
    %c0_i32 = arith.constant 0 : i32
    %c0_i32_0 = arith.constant 0 : i32
    %c0_i32_1 = arith.constant 0 : i32
    return %c0_i32, %c0_i32_0 : i32, i32
  }
  func.func @transform_3(%arg0: i32) -> (i32, i32, i32) {
    %c0_i32 = arith.constant 0 : i32
    %c0_i32_0 = arith.constant 0 : i32
    %c0_i32_1 = arith.constant 0 : i32
    return %arg0, %c0_i32, %c0_i32_0 : i32, i32, i32
  }
}

module attributes {stable_mosaic.version = 11 : i64} {
  func.func @kernel(%arg0: i32, %arg1: i32, %arg2: i32, %arg3: memref<104x9216xbf16, #tpu.memory_space<vmem>>, %arg4: memref<1x9216x1024xi8, #tpu.memory_space<vmem>>, %arg5: memref<1x1x1024xf32, #tpu.memory_space<vmem>>, %arg6: memref<1x104x1024xf32, #tpu.memory_space<vmem>>, %arg7: memref<104x1024xbf16, #tpu.memory_space<vmem>>, %arg8: memref<104x1024xf32, #tpu.memory_space<vmem>>) attributes {dimension_semantics = [#tpu.dimension_semantics<parallel>, #tpu.dimension_semantics<parallel>, #tpu.dimension_semantics<arbitrary>], iteration_bounds = array<i64: 1, 2, 3>, scalar_prefetch = 0 : i64, scratch_operands = 1 : i64, tpu.core_type = #tpu.core_type<tc>, window_params = [{transform_indices = @transform_0, window_bounds = array<i64: 104, 9216>}, {transform_indices = @transform_1, window_bounds = array<i64: 1, 9216, 1024>}, {transform_indices = @transform_2, window_bounds = array<i64: 1, 1, 1024>}, {transform_indices = @transform_3, window_bounds = array<i64: 1, 104, 1024>}, {transform_indices = @transform_4, window_bounds = array<i64: 104, 1024>}]} {
    %c0_i32 = arith.constant 0 : i32
    %0 = arith.cmpi eq, %arg2, %c0_i32 : i32
    %1 = arith.extui %0 : i1 to i32
    %c0_i32_0 = arith.constant 0 : i32
    %2 = arith.cmpi ne, %1, %c0_i32_0 : i32
    scf.if %2 {
      %cst_45 = arith.constant 0.000000e+00 : f32
      %56 = vector.broadcast %cst_45 : f32 to vector<104x1024xf32>
      %c0_46 = arith.constant 0 : index
      %c0_47 = arith.constant 0 : index
      %57 = vector.load %arg8[%c0_46, %c0_47] : memref<104x1024xf32, #tpu.memory_space<vmem>>, vector<104x1024xf32>
      tpu.vector_store %arg8[%c0_46, %c0_47], %56 {strides = array<i32>} : memref<104x1024xf32, #tpu.memory_space<vmem>>, vector<104x1024xf32>,
    } else {
    }
    %c0 = arith.constant 0 : index
    %c0_1 = arith.constant 0 : index
    %3 = vector.load %arg8[%c0, %c0_1] : memref<104x1024xf32, #tpu.memory_space<vmem>>, vector<104x1024xf32>
    %c0_2 = arith.constant 0 : index
    %c0_3 = arith.constant 0 : index
    %4 = vector.load %arg3[%c0_2, %c0_3] : memref<104x9216xbf16, #tpu.memory_space<vmem>>, vector<104x1152xbf16>
    %c0_4 = arith.constant 0 : index
    %c0_5 = arith.constant 0 : index
    %c0_6 = arith.constant 0 : index
    %5 = vector.load %arg4[%c0_4, %c0_5, %c0_6] : memref<1x9216x1024xi8, #tpu.memory_space<vmem>>, vector<1x1152x1024xi8>
    %6 = vector.shape_cast %5 : vector<1x1152x1024xi8> to vector<1152x1024xi8>
    %7 = arith.sitofp %6 : vector<1152x1024xi8> to vector<1152x1024xbf16>
    %cst = arith.constant dense<0.000000e+00> : vector<104x1024xf32>
    %8 = tpu.matmul %4, %7, %cst {dimension_numbers = #tpu.dot_dimension_numbers<[1], [0], [0], [1], [0, 0, 1, 1], [], []>} : vector<104x1152xbf16>, vector<1152x1024xbf16>, vector<104x1024xf32> -> vector<104x1024xf32>
    %9 = arith.addf %3, %8 : vector<104x1024xf32>
    %c0_7 = arith.constant 0 : index
    %c1152 = arith.constant 1152 : index
    %10 = vector.load %arg3[%c0_7, %c1152] : memref<104x9216xbf16, #tpu.memory_space<vmem>>, vector<104x1152xbf16>
    %c0_8 = arith.constant 0 : index
    %c1152_9 = arith.constant 1152 : index
    %c0_10 = arith.constant 0 : index
    %11 = vector.load %arg4[%c0_8, %c1152_9, %c0_10] : memref<1x9216x1024xi8, #tpu.memory_space<vmem>>, vector<1x1152x1024xi8>
    %12 = vector.shape_cast %11 : vector<1x1152x1024xi8> to vector<1152x1024xi8>
    %13 = arith.sitofp %12 : vector<1152x1024xi8> to vector<1152x1024xbf16>
    %cst_11 = arith.constant dense<0.000000e+00> : vector<104x1024xf32>
    %14 = tpu.matmul %10, %13, %cst_11 {dimension_numbers = #tpu.dot_dimension_numbers<[1], [0], [0], [1], [0, 0, 1, 1], [], []>} : vector<104x1152xbf16>, vector<1152x1024xbf16>, vector<104x1024xf32> -> vector<104x1024xf32>
    %15 = arith.addf %9, %14 : vector<104x1024xf32>
    %c0_12 = arith.constant 0 : index
    %c2304 = arith.constant 2304 : index
    %16 = vector.load %arg3[%c0_12, %c2304] : memref<104x9216xbf16, #tpu.memory_space<vmem>>, vector<104x1152xbf16>
    %c0_13 = arith.constant 0 : index
    %c2304_14 = arith.constant 2304 : index
    %c0_15 = arith.constant 0 : index
    %17 = vector.load %arg4[%c0_13, %c2304_14, %c0_15] : memref<1x9216x1024xi8, #tpu.memory_space<vmem>>, vector<1x1152x1024xi8>
    %18 = vector.shape_cast %17 : vector<1x1152x1024xi8> to vector<1152x1024xi8>
    %19 = arith.sitofp %18 : vector<1152x1024xi8> to vector<1152x1024xbf16>
    %cst_16 = arith.constant dense<0.000000e+00> : vector<104x1024xf32>
    %20 = tpu.matmul %16, %19, %cst_16 {dimension_numbers = #tpu.dot_dimension_numbers<[1], [0], [0], [1], [0, 0, 1, 1], [], []>} : vector<104x1152xbf16>, vector<1152x1024xbf16>, vector<104x1024xf32> -> vector<104x1024xf32>
    %21 = arith.addf %15, %20 : vector<104x1024xf32>
    %c0_17 = arith.constant 0 : index
    %c3456 = arith.constant 3456 : index
    %22 = vector.load %arg3[%c0_17, %c3456] : memref<104x9216xbf16, #tpu.memory_space<vmem>>, vector<104x1152xbf16>
    %c0_18 = arith.constant 0 : index
    %c3456_19 = arith.constant 3456 : index
    %c0_20 = arith.constant 0 : index
    %23 = vector.load %arg4[%c0_18, %c3456_19, %c0_20] : memref<1x9216x1024xi8, #tpu.memory_space<vmem>>, vector<1x1152x1024xi8>
    %24 = vector.shape_cast %23 : vector<1x1152x1024xi8> to vector<1152x1024xi8>
    %25 = arith.sitofp %24 : vector<1152x1024xi8> to vector<1152x1024xbf16>
    %cst_21 = arith.constant dense<0.000000e+00> : vector<104x1024xf32>
    %26 = tpu.matmul %22, %25, %cst_21 {dimension_numbers = #tpu.dot_dimension_numbers<[1], [0], [0], [1], [0, 0, 1, 1], [], []>} : vector<104x1152xbf16>, vector<1152x1024xbf16>, vector<104x1024xf32> -> vector<104x1024xf32>
    %27 = arith.addf %21, %26 : vector<104x1024xf32>
    %c0_22 = arith.constant 0 : index
    %c4608 = arith.constant 4608 : index
    %28 = vector.load %arg3[%c0_22, %c4608] : memref<104x9216xbf16, #tpu.memory_space<vmem>>, vector<104x1152xbf16>
    %c0_23 = arith.constant 0 : index
    %c4608_24 = arith.constant 4608 : index
    %c0_25 = arith.constant 0 : index
    %29 = vector.load %arg4[%c0_23, %c4608_24, %c0_25] : memref<1x9216x1024xi8, #tpu.memory_space<vmem>>, vector<1x1152x1024xi8>
    %30 = vector.shape_cast %29 : vector<1x1152x1024xi8> to vector<1152x1024xi8>
    %31 = arith.sitofp %30 : vector<1152x1024xi8> to vector<1152x1024xbf16>
    %cst_26 = arith.constant dense<0.000000e+00> : vector<104x1024xf32>
    %32 = tpu.matmul %28, %31, %cst_26 {dimension_numbers = #tpu.dot_dimension_numbers<[1], [0], [0], [1], [0, 0, 1, 1], [], []>} : vector<104x1152xbf16>, vector<1152x1024xbf16>, vector<104x1024xf32> -> vector<104x1024xf32>
    %33 = arith.addf %27, %32 : vector<104x1024xf32>
    %c0_27 = arith.constant 0 : index
    %c5760 = arith.constant 5760 : index
    %34 = vector.load %arg3[%c0_27, %c5760] : memref<104x9216xbf16, #tpu.memory_space<vmem>>, vector<104x1152xbf16>
    %c0_28 = arith.constant 0 : index
    %c5760_29 = arith.constant 5760 : index
    %c0_30 = arith.constant 0 : index
    %35 = vector.load %arg4[%c0_28, %c5760_29, %c0_30] : memref<1x9216x1024xi8, #tpu.memory_space<vmem>>, vector<1x1152x1024xi8>
    %36 = vector.shape_cast %35 : vector<1x1152x1024xi8> to vector<1152x1024xi8>
    %37 = arith.sitofp %36 : vector<1152x1024xi8> to vector<1152x1024xbf16>
    %cst_31 = arith.constant dense<0.000000e+00> : vector<104x1024xf32>
    %38 = tpu.matmul %34, %37, %cst_31 {dimension_numbers = #tpu.dot_dimension_numbers<[1], [0], [0], [1], [0, 0, 1, 1], [], []>} : vector<104x1152xbf16>, vector<1152x1024xbf16>, vector<104x1024xf32> -> vector<104x1024xf32>
    %39 = arith.addf %33, %38 : vector<104x1024xf32>
    %c0_32 = arith.constant 0 : index
    %c6912 = arith.constant 6912 : index
    %40 = vector.load %arg3[%c0_32, %c6912] : memref<104x9216xbf16, #tpu.memory_space<vmem>>, vector<104x1152xbf16>
    %c0_33 = arith.constant 0 : index
    %c6912_34 = arith.constant 6912 : index
    %c0_35 = arith.constant 0 : index
    %41 = vector.load %arg4[%c0_33, %c6912_34, %c0_35] : memref<1x9216x1024xi8, #tpu.memory_space<vmem>>, vector<1x1152x1024xi8>
    %42 = vector.shape_cast %41 : vector<1x1152x1024xi8> to vector<1152x1024xi8>
    %43 = arith.sitofp %42 : vector<1152x1024xi8> to vector<1152x1024xbf16>
    %cst_36 = arith.constant dense<0.000000e+00> : vector<104x1024xf32>
    %44 = tpu.matmul %40, %43, %cst_36 {dimension_numbers = #tpu.dot_dimension_numbers<[1], [0], [0], [1], [0, 0, 1, 1], [], []>} : vector<104x1152xbf16>, vector<1152x1024xbf16>, vector<104x1024xf32> -> vector<104x1024xf32>
    %45 = arith.addf %39, %44 : vector<104x1024xf32>
    %c0_37 = arith.constant 0 : index
    %c8064 = arith.constant 8064 : index
    %46 = vector.load %arg3[%c0_37, %c8064] : memref<104x9216xbf16, #tpu.memory_space<vmem>>, vector<104x1152xbf16>
    %c0_38 = arith.constant 0 : index
    %c8064_39 = arith.constant 8064 : index
    %c0_40 = arith.constant 0 : index
    %47 = vector.load %arg4[%c0_38, %c8064_39, %c0_40] : memref<1x9216x1024xi8, #tpu.memory_space<vmem>>, vector<1x1152x1024xi8>
    %48 = vector.shape_cast %47 : vector<1x1152x1024xi8> to vector<1152x1024xi8>
    %49 = arith.sitofp %48 : vector<1152x1024xi8> to vector<1152x1024xbf16>
    %cst_41 = arith.constant dense<0.000000e+00> : vector<104x1024xf32>
    %50 = tpu.matmul %46, %49, %cst_41 {dimension_numbers = #tpu.dot_dimension_numbers<[1], [0], [0], [1], [0, 0, 1, 1], [], []>} : vector<104x1152xbf16>, vector<1152x1024xbf16>, vector<104x1024xf32> -> vector<104x1024xf32>
    %51 = arith.addf %45, %50 : vector<104x1024xf32>
    %c0_42 = arith.constant 0 : index
    %c0_43 = arith.constant 0 : index
    %52 = vector.load %arg8[%c0_42, %c0_43] : memref<104x1024xf32, #tpu.memory_space<vmem>>, vector<104x1024xf32>
    tpu.vector_store %arg8[%c0_42, %c0_43], %51 {strides = array<i32>} : memref<104x1024xf32, #tpu.memory_space<vmem>>, vector<104x1024xf32>,
    %c2_i32 = arith.constant 2 : i32
    %53 = arith.cmpi eq, %arg2, %c2_i32 : i32
    %54 = arith.extui %53 : i1 to i32
    %c0_i32_44 = arith.constant 0 : i32
    %55 = arith.cmpi ne, %54, %c0_i32_44 : i32
    scf.if %55 {
      %c0_45 = arith.constant 0 : index
      %c0_46 = arith.constant 0 : index
      %56 = vector.load %arg8[%c0_45, %c0_46] : memref<104x1024xf32, #tpu.memory_space<vmem>>, vector<104x1024xf32>
      %c0_47 = arith.constant 0 : index
      %c0_48 = arith.constant 0 : index
      %c0_49 = arith.constant 0 : index
      %57 = vector.load %arg5[%c0_47, %c0_48, %c0_49] : memref<1x1x1024xf32, #tpu.memory_space<vmem>>, vector<1x1x1024xf32>
      %58 = vector.shape_cast %57 : vector<1x1x1024xf32> to vector<1x1024xf32>
      %59 = vector.broadcast %58 : vector<1x1024xf32> to vector<104x1024xf32>
      %60 = arith.mulf %56, %59 : vector<104x1024xf32>
      %c0_50 = arith.constant 0 : index
      %c0_51 = arith.constant 0 : index
      %c0_52 = arith.constant 0 : index
      %61 = vector.load %arg6[%c0_50, %c0_51, %c0_52] : memref<1x104x1024xf32, #tpu.memory_space<vmem>>, vector<1x104x1024xf32>
      %62 = vector.shape_cast %61 : vector<1x104x1024xf32> to vector<104x1024xf32>
      %63 = arith.addf %60, %62 : vector<104x1024xf32>
      %64 = arith.truncf %63 : vector<104x1024xf32> to vector<104x1024xbf16>
      %c0_53 = arith.constant 0 : index
      %c0_54 = arith.constant 0 : index
      %65 = vector.load %arg7[%c0_53, %c0_54] : memref<104x1024xbf16, #tpu.memory_space<vmem>>, vector<104x1024xbf16>
      tpu.vector_store %arg7[%c0_53, %c0_54], %64 {strides = array<i32>} : memref<104x1024xbf16, #tpu.memory_space<vmem>>, vector<104x1024xbf16>,
    } else {
    }
    return
  }
  func.func @transform_0(%arg0: i32, %arg1: i32, %arg2: i32) -> (i32, i32) {
    %c0_i32 = arith.constant 0 : i32
    return %arg0, %arg2 : i32, i32
  }
  func.func @transform_1(%arg0: i32, %arg1: i32, %arg2: i32) -> (i32, i32, i32) {
    %c0_i32 = arith.constant 0 : i32
    %c0_i32_0 = arith.constant 0 : i32
    return %arg1, %arg2, %c0_i32 : i32, i32, i32
  }
  func.func @transform_2(%arg0: i32, %arg1: i32, %arg2: i32) -> (i32, i32, i32) {
    %c0_i32 = arith.constant 0 : i32
    %c0_i32_0 = arith.constant 0 : i32
    %c0_i32_1 = arith.constant 0 : i32
    return %arg1, %c0_i32, %c0_i32_0 : i32, i32, i32
  }
  func.func @transform_3(%arg0: i32, %arg1: i32, %arg2: i32) -> (i32, i32, i32) {
    %c0_i32 = arith.constant 0 : i32
    %c0_i32_0 = arith.constant 0 : i32
    %c0_i32_1 = arith.constant 0 : i32
    return %arg1, %c0_i32, %c0_i32_0 : i32, i32, i32
  }
  func.func @transform_4(%arg0: i32, %arg1: i32, %arg2: i32) -> (i32, i32) {
    %c0_i32 = arith.constant 0 : i32
    return %arg0, %arg1 : i32, i32
  }
}

module attributes {stable_mosaic.version = 11 : i64} {
  func.func @kernel(%arg0: i32, %arg1: i32, %arg2: i32, %arg3: memref<104x9216xbf16, #tpu.memory_space<vmem>>, %arg4: memref<1x9216x512xi8, #tpu.memory_space<vmem>>, %arg5: memref<1x1x512xf32, #tpu.memory_space<vmem>>, %arg6: memref<1x1x512xf32, #tpu.memory_space<vmem>>, %arg7: memref<104x512xbf16, #tpu.memory_space<vmem>>, %arg8: memref<104x512xf32, #tpu.memory_space<vmem>>) attributes {dimension_semantics = [#tpu.dimension_semantics<parallel>, #tpu.dimension_semantics<parallel>, #tpu.dimension_semantics<arbitrary>], iteration_bounds = array<i64: 1, 2, 2>, scalar_prefetch = 0 : i64, scratch_operands = 1 : i64, tpu.core_type = #tpu.core_type<tc>, window_params = [{transform_indices = @transform_0, window_bounds = array<i64: 104, 9216>}, {transform_indices = @transform_1, window_bounds = array<i64: 1, 9216, 512>}, {transform_indices = @transform_2, window_bounds = array<i64: 1, 1, 512>}, {transform_indices = @transform_3, window_bounds = array<i64: 1, 1, 512>}, {transform_indices = @transform_4, window_bounds = array<i64: 104, 512>}]} {
    %c0_i32 = arith.constant 0 : i32
    %0 = arith.cmpi eq, %arg2, %c0_i32 : i32
    %1 = arith.extui %0 : i1 to i32
    %c0_i32_0 = arith.constant 0 : i32
    %2 = arith.cmpi ne, %1, %c0_i32_0 : i32
    scf.if %2 {
      %cst_45 = arith.constant 0.000000e+00 : f32
      %56 = vector.broadcast %cst_45 : f32 to vector<104x512xf32>
      %c0_46 = arith.constant 0 : index
      %c0_47 = arith.constant 0 : index
      %57 = vector.load %arg8[%c0_46, %c0_47] : memref<104x512xf32, #tpu.memory_space<vmem>>, vector<104x512xf32>
      tpu.vector_store %arg8[%c0_46, %c0_47], %56 {strides = array<i32>} : memref<104x512xf32, #tpu.memory_space<vmem>>, vector<104x512xf32>,
    } else {
    }
    %c0 = arith.constant 0 : index
    %c0_1 = arith.constant 0 : index
    %3 = vector.load %arg8[%c0, %c0_1] : memref<104x512xf32, #tpu.memory_space<vmem>>, vector<104x512xf32>
    %c0_2 = arith.constant 0 : index
    %c0_3 = arith.constant 0 : index
    %4 = vector.load %arg3[%c0_2, %c0_3] : memref<104x9216xbf16, #tpu.memory_space<vmem>>, vector<104x1152xbf16>
    %c0_4 = arith.constant 0 : index
    %c0_5 = arith.constant 0 : index
    %c0_6 = arith.constant 0 : index
    %5 = vector.load %arg4[%c0_4, %c0_5, %c0_6] : memref<1x9216x512xi8, #tpu.memory_space<vmem>>, vector<1x1152x512xi8>
    %6 = vector.shape_cast %5 : vector<1x1152x512xi8> to vector<1152x512xi8>
    %7 = arith.sitofp %6 : vector<1152x512xi8> to vector<1152x512xbf16>
    %cst = arith.constant dense<0.000000e+00> : vector<104x512xf32>
    %8 = tpu.matmul %4, %7, %cst {dimension_numbers = #tpu.dot_dimension_numbers<[1], [0], [0], [1], [0, 0, 1, 1], [], []>} : vector<104x1152xbf16>, vector<1152x512xbf16>, vector<104x512xf32> -> vector<104x512xf32>
    %9 = arith.addf %3, %8 : vector<104x512xf32>
    %c0_7 = arith.constant 0 : index
    %c1152 = arith.constant 1152 : index
    %10 = vector.load %arg3[%c0_7, %c1152] : memref<104x9216xbf16, #tpu.memory_space<vmem>>, vector<104x1152xbf16>
    %c0_8 = arith.constant 0 : index
    %c1152_9 = arith.constant 1152 : index
    %c0_10 = arith.constant 0 : index
    %11 = vector.load %arg4[%c0_8, %c1152_9, %c0_10] : memref<1x9216x512xi8, #tpu.memory_space<vmem>>, vector<1x1152x512xi8>
    %12 = vector.shape_cast %11 : vector<1x1152x512xi8> to vector<1152x512xi8>
    %13 = arith.sitofp %12 : vector<1152x512xi8> to vector<1152x512xbf16>
    %cst_11 = arith.constant dense<0.000000e+00> : vector<104x512xf32>
    %14 = tpu.matmul %10, %13, %cst_11 {dimension_numbers = #tpu.dot_dimension_numbers<[1], [0], [0], [1], [0, 0, 1, 1], [], []>} : vector<104x1152xbf16>, vector<1152x512xbf16>, vector<104x512xf32> -> vector<104x512xf32>
    %15 = arith.addf %9, %14 : vector<104x512xf32>
    %c0_12 = arith.constant 0 : index
    %c2304 = arith.constant 2304 : index
    %16 = vector.load %arg3[%c0_12, %c2304] : memref<104x9216xbf16, #tpu.memory_space<vmem>>, vector<104x1152xbf16>
    %c0_13 = arith.constant 0 : index
    %c2304_14 = arith.constant 2304 : index
    %c0_15 = arith.constant 0 : index
    %17 = vector.load %arg4[%c0_13, %c2304_14, %c0_15] : memref<1x9216x512xi8, #tpu.memory_space<vmem>>, vector<1x1152x512xi8>
    %18 = vector.shape_cast %17 : vector<1x1152x512xi8> to vector<1152x512xi8>
    %19 = arith.sitofp %18 : vector<1152x512xi8> to vector<1152x512xbf16>
    %cst_16 = arith.constant dense<0.000000e+00> : vector<104x512xf32>
    %20 = tpu.matmul %16, %19, %cst_16 {dimension_numbers = #tpu.dot_dimension_numbers<[1], [0], [0], [1], [0, 0, 1, 1], [], []>} : vector<104x1152xbf16>, vector<1152x512xbf16>, vector<104x512xf32> -> vector<104x512xf32>
    %21 = arith.addf %15, %20 : vector<104x512xf32>
    %c0_17 = arith.constant 0 : index
    %c3456 = arith.constant 3456 : index
    %22 = vector.load %arg3[%c0_17, %c3456] : memref<104x9216xbf16, #tpu.memory_space<vmem>>, vector<104x1152xbf16>
    %c0_18 = arith.constant 0 : index
    %c3456_19 = arith.constant 3456 : index
    %c0_20 = arith.constant 0 : index
    %23 = vector.load %arg4[%c0_18, %c3456_19, %c0_20] : memref<1x9216x512xi8, #tpu.memory_space<vmem>>, vector<1x1152x512xi8>
    %24 = vector.shape_cast %23 : vector<1x1152x512xi8> to vector<1152x512xi8>
    %25 = arith.sitofp %24 : vector<1152x512xi8> to vector<1152x512xbf16>
    %cst_21 = arith.constant dense<0.000000e+00> : vector<104x512xf32>
    %26 = tpu.matmul %22, %25, %cst_21 {dimension_numbers = #tpu.dot_dimension_numbers<[1], [0], [0], [1], [0, 0, 1, 1], [], []>} : vector<104x1152xbf16>, vector<1152x512xbf16>, vector<104x512xf32> -> vector<104x512xf32>
    %27 = arith.addf %21, %26 : vector<104x512xf32>
    %c0_22 = arith.constant 0 : index
    %c4608 = arith.constant 4608 : index
    %28 = vector.load %arg3[%c0_22, %c4608] : memref<104x9216xbf16, #tpu.memory_space<vmem>>, vector<104x1152xbf16>
    %c0_23 = arith.constant 0 : index
    %c4608_24 = arith.constant 4608 : index
    %c0_25 = arith.constant 0 : index
    %29 = vector.load %arg4[%c0_23, %c4608_24, %c0_25] : memref<1x9216x512xi8, #tpu.memory_space<vmem>>, vector<1x1152x512xi8>
    %30 = vector.shape_cast %29 : vector<1x1152x512xi8> to vector<1152x512xi8>
    %31 = arith.sitofp %30 : vector<1152x512xi8> to vector<1152x512xbf16>
    %cst_26 = arith.constant dense<0.000000e+00> : vector<104x512xf32>
    %32 = tpu.matmul %28, %31, %cst_26 {dimension_numbers = #tpu.dot_dimension_numbers<[1], [0], [0], [1], [0, 0, 1, 1], [], []>} : vector<104x1152xbf16>, vector<1152x512xbf16>, vector<104x512xf32> -> vector<104x512xf32>
    %33 = arith.addf %27, %32 : vector<104x512xf32>
    %c0_27 = arith.constant 0 : index
    %c5760 = arith.constant 5760 : index
    %34 = vector.load %arg3[%c0_27, %c5760] : memref<104x9216xbf16, #tpu.memory_space<vmem>>, vector<104x1152xbf16>
    %c0_28 = arith.constant 0 : index
    %c5760_29 = arith.constant 5760 : index
    %c0_30 = arith.constant 0 : index
    %35 = vector.load %arg4[%c0_28, %c5760_29, %c0_30] : memref<1x9216x512xi8, #tpu.memory_space<vmem>>, vector<1x1152x512xi8>
    %36 = vector.shape_cast %35 : vector<1x1152x512xi8> to vector<1152x512xi8>
    %37 = arith.sitofp %36 : vector<1152x512xi8> to vector<1152x512xbf16>
    %cst_31 = arith.constant dense<0.000000e+00> : vector<104x512xf32>
    %38 = tpu.matmul %34, %37, %cst_31 {dimension_numbers = #tpu.dot_dimension_numbers<[1], [0], [0], [1], [0, 0, 1, 1], [], []>} : vector<104x1152xbf16>, vector<1152x512xbf16>, vector<104x512xf32> -> vector<104x512xf32>
    %39 = arith.addf %33, %38 : vector<104x512xf32>
    %c0_32 = arith.constant 0 : index
    %c6912 = arith.constant 6912 : index
    %40 = vector.load %arg3[%c0_32, %c6912] : memref<104x9216xbf16, #tpu.memory_space<vmem>>, vector<104x1152xbf16>
    %c0_33 = arith.constant 0 : index
    %c6912_34 = arith.constant 6912 : index
    %c0_35 = arith.constant 0 : index
    %41 = vector.load %arg4[%c0_33, %c6912_34, %c0_35] : memref<1x9216x512xi8, #tpu.memory_space<vmem>>, vector<1x1152x512xi8>
    %42 = vector.shape_cast %41 : vector<1x1152x512xi8> to vector<1152x512xi8>
    %43 = arith.sitofp %42 : vector<1152x512xi8> to vector<1152x512xbf16>
    %cst_36 = arith.constant dense<0.000000e+00> : vector<104x512xf32>
    %44 = tpu.matmul %40, %43, %cst_36 {dimension_numbers = #tpu.dot_dimension_numbers<[1], [0], [0], [1], [0, 0, 1, 1], [], []>} : vector<104x1152xbf16>, vector<1152x512xbf16>, vector<104x512xf32> -> vector<104x512xf32>
    %45 = arith.addf %39, %44 : vector<104x512xf32>
    %c0_37 = arith.constant 0 : index
    %c8064 = arith.constant 8064 : index
    %46 = vector.load %arg3[%c0_37, %c8064] : memref<104x9216xbf16, #tpu.memory_space<vmem>>, vector<104x1152xbf16>
    %c0_38 = arith.constant 0 : index
    %c8064_39 = arith.constant 8064 : index
    %c0_40 = arith.constant 0 : index
    %47 = vector.load %arg4[%c0_38, %c8064_39, %c0_40] : memref<1x9216x512xi8, #tpu.memory_space<vmem>>, vector<1x1152x512xi8>
    %48 = vector.shape_cast %47 : vector<1x1152x512xi8> to vector<1152x512xi8>
    %49 = arith.sitofp %48 : vector<1152x512xi8> to vector<1152x512xbf16>
    %cst_41 = arith.constant dense<0.000000e+00> : vector<104x512xf32>
    %50 = tpu.matmul %46, %49, %cst_41 {dimension_numbers = #tpu.dot_dimension_numbers<[1], [0], [0], [1], [0, 0, 1, 1], [], []>} : vector<104x1152xbf16>, vector<1152x512xbf16>, vector<104x512xf32> -> vector<104x512xf32>
    %51 = arith.addf %45, %50 : vector<104x512xf32>
    %c0_42 = arith.constant 0 : index
    %c0_43 = arith.constant 0 : index
    %52 = vector.load %arg8[%c0_42, %c0_43] : memref<104x512xf32, #tpu.memory_space<vmem>>, vector<104x512xf32>
    tpu.vector_store %arg8[%c0_42, %c0_43], %51 {strides = array<i32>} : memref<104x512xf32, #tpu.memory_space<vmem>>, vector<104x512xf32>,
    %c1_i32 = arith.constant 1 : i32
    %53 = arith.cmpi eq, %arg2, %c1_i32 : i32
    %54 = arith.extui %53 : i1 to i32
    %c0_i32_44 = arith.constant 0 : i32
    %55 = arith.cmpi ne, %54, %c0_i32_44 : i32
    scf.if %55 {
      %c0_45 = arith.constant 0 : index
      %c0_46 = arith.constant 0 : index
      %56 = vector.load %arg8[%c0_45, %c0_46] : memref<104x512xf32, #tpu.memory_space<vmem>>, vector<104x512xf32>
      %c0_47 = arith.constant 0 : index
      %c0_48 = arith.constant 0 : index
      %c0_49 = arith.constant 0 : index
      %57 = vector.load %arg5[%c0_47, %c0_48, %c0_49] : memref<1x1x512xf32, #tpu.memory_space<vmem>>, vector<1x1x512xf32>
      %58 = vector.shape_cast %57 : vector<1x1x512xf32> to vector<1x512xf32>
      %59 = vector.broadcast %58 : vector<1x512xf32> to vector<104x512xf32>
      %60 = arith.mulf %56, %59 : vector<104x512xf32>
      %c0_50 = arith.constant 0 : index
      %c0_51 = arith.constant 0 : index
      %c0_52 = arith.constant 0 : index
      %61 = vector.load %arg6[%c0_50, %c0_51, %c0_52] : memref<1x1x512xf32, #tpu.memory_space<vmem>>, vector<1x1x512xf32>
      %62 = vector.shape_cast %61 : vector<1x1x512xf32> to vector<1x512xf32>
      %63 = vector.broadcast %62 : vector<1x512xf32> to vector<104x512xf32>
      %64 = arith.addf %60, %63 : vector<104x512xf32>
      %cst_53 = arith.constant 0.000000e+00 : f32
      %65 = vector.broadcast %cst_53 : f32 to vector<104x512xf32>
      %66 = arith.maximumf %64, %65 : vector<104x512xf32>
      %67 = arith.truncf %66 : vector<104x512xf32> to vector<104x512xbf16>
      %c0_54 = arith.constant 0 : index
      %c0_55 = arith.constant 0 : index
      %68 = vector.load %arg7[%c0_54, %c0_55] : memref<104x512xbf16, #tpu.memory_space<vmem>>, vector<104x512xbf16>
      tpu.vector_store %arg7[%c0_54, %c0_55], %67 {strides = array<i32>} : memref<104x512xbf16, #tpu.memory_space<vmem>>, vector<104x512xbf16>,
    } else {
    }
    return
  }
  func.func @transform_0(%arg0: i32, %arg1: i32, %arg2: i32) -> (i32, i32) {
    %c0_i32 = arith.constant 0 : i32
    return %arg0, %arg2 : i32, i32
  }
  func.func @transform_1(%arg0: i32, %arg1: i32, %arg2: i32) -> (i32, i32, i32) {
    %c0_i32 = arith.constant 0 : i32
    %c0_i32_0 = arith.constant 0 : i32
    return %arg1, %arg2, %c0_i32 : i32, i32, i32
  }
  func.func @transform_2(%arg0: i32, %arg1: i32, %arg2: i32) -> (i32, i32, i32) {
    %c0_i32 = arith.constant 0 : i32
    %c0_i32_0 = arith.constant 0 : i32
    %c0_i32_1 = arith.constant 0 : i32
    return %arg1, %c0_i32, %c0_i32_0 : i32, i32, i32
  }
  func.func @transform_3(%arg0: i32, %arg1: i32, %arg2: i32) -> (i32, i32, i32) {
    %c0_i32 = arith.constant 0 : i32
    %c0_i32_0 = arith.constant 0 : i32
    %c0_i32_1 = arith.constant 0 : i32
    return %arg1, %c0_i32, %c0_i32_0 : i32, i32, i32
  }
  func.func @transform_4(%arg0: i32, %arg1: i32, %arg2: i32) -> (i32, i32) {
    %c0_i32 = arith.constant 0 : i32
    return %arg0, %arg1 : i32, i32
  }
}

module attributes {stable_mosaic.version = 11 : i64} {
  func.func @kernel(%arg0: i32, %arg1: i32, %arg2: i32, %arg3: memref<104x9216xbf16, #tpu.memory_space<vmem>>, %arg4: memref<1x9216x256xi8, #tpu.memory_space<vmem>>, %arg5: memref<1x1x256xf32, #tpu.memory_space<vmem>>, %arg6: memref<1x1x256xf32, #tpu.memory_space<vmem>>, %arg7: memref<104x256xbf16, #tpu.memory_space<vmem>>, %arg8: memref<104x256xf32, #tpu.memory_space<vmem>>) attributes {dimension_semantics = [#tpu.dimension_semantics<parallel>, #tpu.dimension_semantics<parallel>, #tpu.dimension_semantics<arbitrary>], iteration_bounds = array<i64: 1, 2, 1>, scalar_prefetch = 0 : i64, scratch_operands = 1 : i64, tpu.core_type = #tpu.core_type<tc>, window_params = [{transform_indices = @transform_0, window_bounds = array<i64: 104, 9216>}, {transform_indices = @transform_1, window_bounds = array<i64: 1, 9216, 256>}, {transform_indices = @transform_2, window_bounds = array<i64: 1, 1, 256>}, {transform_indices = @transform_3, window_bounds = array<i64: 1, 1, 256>}, {transform_indices = @transform_4, window_bounds = array<i64: 104, 256>}]} {
    %c0_i32 = arith.constant 0 : i32
    %0 = arith.cmpi eq, %arg2, %c0_i32 : i32
    %1 = arith.extui %0 : i1 to i32
    %c0_i32_0 = arith.constant 0 : i32
    %2 = arith.cmpi ne, %1, %c0_i32_0 : i32
    scf.if %2 {
      %cst_46 = arith.constant 0.000000e+00 : f32
      %56 = vector.broadcast %cst_46 : f32 to vector<104x256xf32>
      %c0_47 = arith.constant 0 : index
      %c0_48 = arith.constant 0 : index
      %57 = vector.load %arg8[%c0_47, %c0_48] : memref<104x256xf32, #tpu.memory_space<vmem>>, vector<104x256xf32>
      tpu.vector_store %arg8[%c0_47, %c0_48], %56 {strides = array<i32>} : memref<104x256xf32, #tpu.memory_space<vmem>>, vector<104x256xf32>,
    } else {
    }
    %c0 = arith.constant 0 : index
    %c0_1 = arith.constant 0 : index
    %3 = vector.load %arg8[%c0, %c0_1] : memref<104x256xf32, #tpu.memory_space<vmem>>, vector<104x256xf32>
    %c0_2 = arith.constant 0 : index
    %c0_3 = arith.constant 0 : index
    %4 = vector.load %arg3[%c0_2, %c0_3] : memref<104x9216xbf16, #tpu.memory_space<vmem>>, vector<104x1152xbf16>
    %c0_4 = arith.constant 0 : index
    %c0_5 = arith.constant 0 : index
    %c0_6 = arith.constant 0 : index
    %5 = vector.load %arg4[%c0_4, %c0_5, %c0_6] : memref<1x9216x256xi8, #tpu.memory_space<vmem>>, vector<1x1152x256xi8>
    %6 = vector.shape_cast %5 : vector<1x1152x256xi8> to vector<1152x256xi8>
    %7 = arith.sitofp %6 : vector<1152x256xi8> to vector<1152x256xbf16>
    %cst = arith.constant dense<0.000000e+00> : vector<104x256xf32>
    %8 = tpu.matmul %4, %7, %cst {dimension_numbers = #tpu.dot_dimension_numbers<[1], [0], [0], [1], [0, 0, 1, 1], [], []>} : vector<104x1152xbf16>, vector<1152x256xbf16>, vector<104x256xf32> -> vector<104x256xf32>
    %9 = arith.addf %3, %8 : vector<104x256xf32>
    %c0_7 = arith.constant 0 : index
    %c1152 = arith.constant 1152 : index
    %10 = vector.load %arg3[%c0_7, %c1152] : memref<104x9216xbf16, #tpu.memory_space<vmem>>, vector<104x1152xbf16>
    %c0_8 = arith.constant 0 : index
    %c1152_9 = arith.constant 1152 : index
    %c0_10 = arith.constant 0 : index
    %11 = vector.load %arg4[%c0_8, %c1152_9, %c0_10] : memref<1x9216x256xi8, #tpu.memory_space<vmem>>, vector<1x1152x256xi8>
    %12 = vector.shape_cast %11 : vector<1x1152x256xi8> to vector<1152x256xi8>
    %13 = arith.sitofp %12 : vector<1152x256xi8> to vector<1152x256xbf16>
    %cst_11 = arith.constant dense<0.000000e+00> : vector<104x256xf32>
    %14 = tpu.matmul %10, %13, %cst_11 {dimension_numbers = #tpu.dot_dimension_numbers<[1], [0], [0], [1], [0, 0, 1, 1], [], []>} : vector<104x1152xbf16>, vector<1152x256xbf16>, vector<104x256xf32> -> vector<104x256xf32>
    %15 = arith.addf %9, %14 : vector<104x256xf32>
    %c0_12 = arith.constant 0 : index
    %c2304 = arith.constant 2304 : index
    %16 = vector.load %arg3[%c0_12, %c2304] : memref<104x9216xbf16, #tpu.memory_space<vmem>>, vector<104x1152xbf16>
    %c0_13 = arith.constant 0 : index
    %c2304_14 = arith.constant 2304 : index
    %c0_15 = arith.constant 0 : index
    %17 = vector.load %arg4[%c0_13, %c2304_14, %c0_15] : memref<1x9216x256xi8, #tpu.memory_space<vmem>>, vector<1x1152x256xi8>
    %18 = vector.shape_cast %17 : vector<1x1152x256xi8> to vector<1152x256xi8>
    %19 = arith.sitofp %18 : vector<1152x256xi8> to vector<1152x256xbf16>
    %cst_16 = arith.constant dense<0.000000e+00> : vector<104x256xf32>
    %20 = tpu.matmul %16, %19, %cst_16 {dimension_numbers = #tpu.dot_dimension_numbers<[1], [0], [0], [1], [0, 0, 1, 1], [], []>} : vector<104x1152xbf16>, vector<1152x256xbf16>, vector<104x256xf32> -> vector<104x256xf32>
    %21 = arith.addf %15, %20 : vector<104x256xf32>
    %c0_17 = arith.constant 0 : index
    %c3456 = arith.constant 3456 : index
    %22 = vector.load %arg3[%c0_17, %c3456] : memref<104x9216xbf16, #tpu.memory_space<vmem>>, vector<104x1152xbf16>
    %c0_18 = arith.constant 0 : index
    %c3456_19 = arith.constant 3456 : index
    %c0_20 = arith.constant 0 : index
    %23 = vector.load %arg4[%c0_18, %c3456_19, %c0_20] : memref<1x9216x256xi8, #tpu.memory_space<vmem>>, vector<1x1152x256xi8>
    %24 = vector.shape_cast %23 : vector<1x1152x256xi8> to vector<1152x256xi8>
    %25 = arith.sitofp %24 : vector<1152x256xi8> to vector<1152x256xbf16>
    %cst_21 = arith.constant dense<0.000000e+00> : vector<104x256xf32>
    %26 = tpu.matmul %22, %25, %cst_21 {dimension_numbers = #tpu.dot_dimension_numbers<[1], [0], [0], [1], [0, 0, 1, 1], [], []>} : vector<104x1152xbf16>, vector<1152x256xbf16>, vector<104x256xf32> -> vector<104x256xf32>
    %27 = arith.addf %21, %26 : vector<104x256xf32>
    %c0_22 = arith.constant 0 : index
    %c4608 = arith.constant 4608 : index
    %28 = vector.load %arg3[%c0_22, %c4608] : memref<104x9216xbf16, #tpu.memory_space<vmem>>, vector<104x1152xbf16>
    %c0_23 = arith.constant 0 : index
    %c4608_24 = arith.constant 4608 : index
    %c0_25 = arith.constant 0 : index
    %29 = vector.load %arg4[%c0_23, %c4608_24, %c0_25] : memref<1x9216x256xi8, #tpu.memory_space<vmem>>, vector<1x1152x256xi8>
    %30 = vector.shape_cast %29 : vector<1x1152x256xi8> to vector<1152x256xi8>
    %31 = arith.sitofp %30 : vector<1152x256xi8> to vector<1152x256xbf16>
    %cst_26 = arith.constant dense<0.000000e+00> : vector<104x256xf32>
    %32 = tpu.matmul %28, %31, %cst_26 {dimension_numbers = #tpu.dot_dimension_numbers<[1], [0], [0], [1], [0, 0, 1, 1], [], []>} : vector<104x1152xbf16>, vector<1152x256xbf16>, vector<104x256xf32> -> vector<104x256xf32>
    %33 = arith.addf %27, %32 : vector<104x256xf32>
    %c0_27 = arith.constant 0 : index
    %c5760 = arith.constant 5760 : index
    %34 = vector.load %arg3[%c0_27, %c5760] : memref<104x9216xbf16, #tpu.memory_space<vmem>>, vector<104x1152xbf16>
    %c0_28 = arith.constant 0 : index
    %c5760_29 = arith.constant 5760 : index
    %c0_30 = arith.constant 0 : index
    %35 = vector.load %arg4[%c0_28, %c5760_29, %c0_30] : memref<1x9216x256xi8, #tpu.memory_space<vmem>>, vector<1x1152x256xi8>
    %36 = vector.shape_cast %35 : vector<1x1152x256xi8> to vector<1152x256xi8>
    %37 = arith.sitofp %36 : vector<1152x256xi8> to vector<1152x256xbf16>
    %cst_31 = arith.constant dense<0.000000e+00> : vector<104x256xf32>
    %38 = tpu.matmul %34, %37, %cst_31 {dimension_numbers = #tpu.dot_dimension_numbers<[1], [0], [0], [1], [0, 0, 1, 1], [], []>} : vector<104x1152xbf16>, vector<1152x256xbf16>, vector<104x256xf32> -> vector<104x256xf32>
    %39 = arith.addf %33, %38 : vector<104x256xf32>
    %c0_32 = arith.constant 0 : index
    %c6912 = arith.constant 6912 : index
    %40 = vector.load %arg3[%c0_32, %c6912] : memref<104x9216xbf16, #tpu.memory_space<vmem>>, vector<104x1152xbf16>
    %c0_33 = arith.constant 0 : index
    %c6912_34 = arith.constant 6912 : index
    %c0_35 = arith.constant 0 : index
    %41 = vector.load %arg4[%c0_33, %c6912_34, %c0_35] : memref<1x9216x256xi8, #tpu.memory_space<vmem>>, vector<1x1152x256xi8>
    %42 = vector.shape_cast %41 : vector<1x1152x256xi8> to vector<1152x256xi8>
    %43 = arith.sitofp %42 : vector<1152x256xi8> to vector<1152x256xbf16>
    %cst_36 = arith.constant dense<0.000000e+00> : vector<104x256xf32>
    %44 = tpu.matmul %40, %43, %cst_36 {dimension_numbers = #tpu.dot_dimension_numbers<[1], [0], [0], [1], [0, 0, 1, 1], [], []>} : vector<104x1152xbf16>, vector<1152x256xbf16>, vector<104x256xf32> -> vector<104x256xf32>
    %45 = arith.addf %39, %44 : vector<104x256xf32>
    %c0_37 = arith.constant 0 : index
    %c8064 = arith.constant 8064 : index
    %46 = vector.load %arg3[%c0_37, %c8064] : memref<104x9216xbf16, #tpu.memory_space<vmem>>, vector<104x1152xbf16>
    %c0_38 = arith.constant 0 : index
    %c8064_39 = arith.constant 8064 : index
    %c0_40 = arith.constant 0 : index
    %47 = vector.load %arg4[%c0_38, %c8064_39, %c0_40] : memref<1x9216x256xi8, #tpu.memory_space<vmem>>, vector<1x1152x256xi8>
    %48 = vector.shape_cast %47 : vector<1x1152x256xi8> to vector<1152x256xi8>
    %49 = arith.sitofp %48 : vector<1152x256xi8> to vector<1152x256xbf16>
    %cst_41 = arith.constant dense<0.000000e+00> : vector<104x256xf32>
    %50 = tpu.matmul %46, %49, %cst_41 {dimension_numbers = #tpu.dot_dimension_numbers<[1], [0], [0], [1], [0, 0, 1, 1], [], []>} : vector<104x1152xbf16>, vector<1152x256xbf16>, vector<104x256xf32> -> vector<104x256xf32>
    %51 = arith.addf %45, %50 : vector<104x256xf32>
    %c0_42 = arith.constant 0 : index
    %c0_43 = arith.constant 0 : index
    %52 = vector.load %arg8[%c0_42, %c0_43] : memref<104x256xf32, #tpu.memory_space<vmem>>, vector<104x256xf32>
    tpu.vector_store %arg8[%c0_42, %c0_43], %51 {strides = array<i32>} : memref<104x256xf32, #tpu.memory_space<vmem>>, vector<104x256xf32>,
    %c0_i32_44 = arith.constant 0 : i32
    %53 = arith.cmpi eq, %arg2, %c0_i32_44 : i32
    %54 = arith.extui %53 : i1 to i32
    %c0_i32_45 = arith.constant 0 : i32
    %55 = arith.cmpi ne, %54, %c0_i32_45 : i32
    scf.if %55 {
      %c0_46 = arith.constant 0 : index
      %c0_47 = arith.constant 0 : index
      %56 = vector.load %arg8[%c0_46, %c0_47] : memref<104x256xf32, #tpu.memory_space<vmem>>, vector<104x256xf32>
      %c0_48 = arith.constant 0 : index
      %c0_49 = arith.constant 0 : index
      %c0_50 = arith.constant 0 : index
      %57 = vector.load %arg5[%c0_48, %c0_49, %c0_50] : memref<1x1x256xf32, #tpu.memory_space<vmem>>, vector<1x1x256xf32>
      %58 = vector.shape_cast %57 : vector<1x1x256xf32> to vector<1x256xf32>
      %59 = vector.broadcast %58 : vector<1x256xf32> to vector<104x256xf32>
      %60 = arith.mulf %56, %59 : vector<104x256xf32>
      %c0_51 = arith.constant 0 : index
      %c0_52 = arith.constant 0 : index
      %c0_53 = arith.constant 0 : index
      %61 = vector.load %arg6[%c0_51, %c0_52, %c0_53] : memref<1x1x256xf32, #tpu.memory_space<vmem>>, vector<1x1x256xf32>
      %62 = vector.shape_cast %61 : vector<1x1x256xf32> to vector<1x256xf32>
      %63 = vector.broadcast %62 : vector<1x256xf32> to vector<104x256xf32>
      %64 = arith.addf %60, %63 : vector<104x256xf32>
      %cst_54 = arith.constant 0.000000e+00 : f32
      %65 = vector.broadcast %cst_54 : f32 to vector<104x256xf32>
      %66 = arith.maximumf %64, %65 : vector<104x256xf32>
      %67 = arith.truncf %66 : vector<104x256xf32> to vector<104x256xbf16>
      %c0_55 = arith.constant 0 : index
      %c0_56 = arith.constant 0 : index
      %68 = vector.load %arg7[%c0_55, %c0_56] : memref<104x256xbf16, #tpu.memory_space<vmem>>, vector<104x256xbf16>
      tpu.vector_store %arg7[%c0_55, %c0_56], %67 {strides = array<i32>} : memref<104x256xbf16, #tpu.memory_space<vmem>>, vector<104x256xbf16>,
    } else {
    }
    return
  }
  func.func @transform_0(%arg0: i32, %arg1: i32, %arg2: i32) -> (i32, i32) {
    %c0_i32 = arith.constant 0 : i32
    return %arg0, %arg2 : i32, i32
  }
  func.func @transform_1(%arg0: i32, %arg1: i32, %arg2: i32) -> (i32, i32, i32) {
    %c0_i32 = arith.constant 0 : i32
    %c0_i32_0 = arith.constant 0 : i32
    return %arg1, %arg2, %c0_i32 : i32, i32, i32
  }
  func.func @transform_2(%arg0: i32, %arg1: i32, %arg2: i32) -> (i32, i32, i32) {
    %c0_i32 = arith.constant 0 : i32
    %c0_i32_0 = arith.constant 0 : i32
    %c0_i32_1 = arith.constant 0 : i32
    return %arg1, %c0_i32, %c0_i32_0 : i32, i32, i32
  }
  func.func @transform_3(%arg0: i32, %arg1: i32, %arg2: i32) -> (i32, i32, i32) {
    %c0_i32 = arith.constant 0 : i32
    %c0_i32_0 = arith.constant 0 : i32
    %c0_i32_1 = arith.constant 0 : i32
    return %arg1, %c0_i32, %c0_i32_0 : i32, i32, i32
  }
  func.func @transform_4(%arg0: i32, %arg1: i32, %arg2: i32) -> (i32, i32) {
    %c0_i32 = arith.constant 0 : i32
    return %arg0, %arg1 : i32, i32
  }
}

module attributes {stable_mosaic.version = 11 : i64} {
  func.func @_head_kernel(%arg0: memref<98x512xbf16, #tpu.memory_space<vmem>>, %arg1: memref<512x18xbf16, #tpu.memory_space<vmem>>, %arg2: memref<1x18xf32, #tpu.memory_space<vmem>>, %arg3: memref<2x98xf32, #tpu.memory_space<vmem>>, %arg4: memref<18x18xf32, #tpu.memory_space<vmem>>, %arg5: memref<1x18xf32, #tpu.memory_space<vmem>>, %arg6: memref<2x18xf32, #tpu.memory_space<vmem>>) attributes {dimension_semantics = [], scalar_prefetch = 0 : i64, scratch_operands = 0 : i64, tpu.core_type = #tpu.core_type<tc>} {
    %c0 = arith.constant 0 : index
    %c0_0 = arith.constant 0 : index
    %0 = vector.load %arg0[%c0, %c0_0] : memref<98x512xbf16, #tpu.memory_space<vmem>>, vector<98x512xbf16>
    %c0_1 = arith.constant 0 : index
    %c0_2 = arith.constant 0 : index
    %1 = vector.load %arg1[%c0_1, %c0_2] : memref<512x18xbf16, #tpu.memory_space<vmem>>, vector<512x18xbf16>
    %cst = arith.constant dense<0.000000e+00> : vector<98x18xf32>
    %2 = tpu.matmul %0, %1, %cst {dimension_numbers = #tpu.dot_dimension_numbers<[1], [0], [0], [1], [0, 0, 1, 1], [], []>} : vector<98x512xbf16>, vector<512x18xbf16>, vector<98x18xf32> -> vector<98x18xf32>
    %c0_3 = arith.constant 0 : index
    %c0_4 = arith.constant 0 : index
    %3 = vector.load %arg2[%c0_3, %c0_4] : memref<1x18xf32, #tpu.memory_space<vmem>>, vector<1x18xf32>
    %4 = vector.broadcast %3 : vector<1x18xf32> to vector<98x18xf32>
    %5 = arith.addf %2, %4 : vector<98x18xf32>
    %cst_5 = arith.constant 0.000000e+00 : f32
    %6 = vector.broadcast %cst_5 : f32 to vector<98x18xf32>
    %7 = arith.maximumf %5, %6 : vector<98x18xf32>
    %c0_6 = arith.constant 0 : index
    %c0_7 = arith.constant 0 : index
    %8 = vector.load %arg3[%c0_6, %c0_7] : memref<2x98xf32, #tpu.memory_space<vmem>>, vector<2x98xf32>
    %cst_8 = arith.constant dense<0.000000e+00> : vector<2x18xf32>
    %9 = tpu.matmul %8, %7, %cst_8 {dimension_numbers = #tpu.dot_dimension_numbers<[1], [0], [0], [1], [0, 0, 1, 1], [], []>} : vector<2x98xf32>, vector<98x18xf32>, vector<2x18xf32> -> vector<2x18xf32>
    %c0_9 = arith.constant 0 : index
    %c0_10 = arith.constant 0 : index
    %10 = vector.load %arg4[%c0_9, %c0_10] : memref<18x18xf32, #tpu.memory_space<vmem>>, vector<18x18xf32>
    %cst_11 = arith.constant dense<0.000000e+00> : vector<2x18xf32>
    %11 = tpu.matmul %9, %10, %cst_11 {dimension_numbers = #tpu.dot_dimension_numbers<[1], [0], [0], [1], [0, 0, 1, 1], [], []>} : vector<2x18xf32>, vector<18x18xf32>, vector<2x18xf32> -> vector<2x18xf32>
    %c0_12 = arith.constant 0 : index
    %c0_13 = arith.constant 0 : index
    %12 = vector.load %arg5[%c0_12, %c0_13] : memref<1x18xf32, #tpu.memory_space<vmem>>, vector<1x18xf32>
    %13 = vector.broadcast %12 : vector<1x18xf32> to vector<2x18xf32>
    %14 = arith.addf %11, %13 : vector<2x18xf32>
    %cst_14 = arith.constant dense<0xFF800000> : vector<2xf32>
    %15 = vector.multi_reduction <maximumf>, %14, %cst_14 [1] : vector<2x18xf32> to vector<2xf32>
    %16 = vector.shape_cast %15 : vector<2xf32> to vector<2x1xf32>
    %17 = vector.broadcast %16 : vector<2x1xf32> to vector<2x18xf32>
    %18 = arith.subf %14, %17 : vector<2x18xf32>
    %19 = math.exp %18 : vector<2x18xf32>
    %cst_15 = arith.constant dense<0.000000e+00> : vector<2xf32>
    %20 = vector.multi_reduction <add>, %19, %cst_15 [1] : vector<2x18xf32> to vector<2xf32>
    %21 = vector.shape_cast %20 : vector<2xf32> to vector<2x1xf32>
    %22 = vector.broadcast %21 : vector<2x1xf32> to vector<2x18xf32>
    %23 = arith.divf %19, %22 : vector<2x18xf32>
    %c0_16 = arith.constant 0 : index
    %c0_17 = arith.constant 0 : index
    %24 = vector.load %arg6[%c0_16, %c0_17] : memref<2x18xf32, #tpu.memory_space<vmem>>, vector<2x18xf32>
    tpu.vector_store %arg6[%c0_16, %c0_17], %23 {strides = array<i32>} : memref<2x18xf32, #tpu.memory_space<vmem>>, vector<2x18xf32>,
    return
  }
}

</mosaic_0001>

<bundles_post_ra>
// kernel: tile.9
= control target key start
LH: loop header
LB: loop body
LE: loop exit
PB: predicated region body
PF: predicated region fallthrough
CT: control target
= control target key end

     0   :  { %vm388_vm0 = vcmask 1047556   ;;  %s2996_s0 = inlined_call_operand.vmem [shape: f32[2,49,2048], index: 0, kind: input, shape index: {}]   ;;  %s2997_s1 = inlined_call_operand.vmem [shape: f32[98,2048], index: 1, kind: output, shape index: {}]  }
   0x1   :  { %v2_v0 = vld [vmem:[%s2996_s0] sm:$0xff]   ;;  %v1000_v1 = vld [vmem:[%s2996_s0 + $0x8] sm:$0xff]   ;;  %v1002_v2 = vld [vmem:[%s2996_s0 + $0x10] sm:$0xff]  }
   0x2   :  { %3 = vst [vmem:[%s2997_s1] sm:$0xff] %v2_v0   ;;  %v1004_v3 = vld [vmem:[%s2996_s0 + $0x18] sm:$0xff]   ;;  %v1006_v4 = vld [vmem:[%s2996_s0 + $0x20] sm:$0xff]   ;;  %v1008_v5 = vld [vmem:[%s2996_s0 + $0x28] sm:$0xff]  }
   0x3   :  { %1001 = vst [vmem:[%s2997_s1 + $0x8] sm:$0xff] %v1000_v1   ;;  %v1010_v6 = vld [vmem:[%s2996_s0 + $0x30] sm:$0xff]   ;;  %v1012_v7 = vld [vmem:[%s2996_s0 + $0x38] sm:$0xff]   ;;  %v1014_v8 = vld [vmem:[%s2996_s0 + $0x40] sm:$0xff]  }
   0x4   :  { %1003 = vst [vmem:[%s2997_s1 + $0x10] sm:$0xff] %v1002_v2   ;;  %v1016_v9 = vld [vmem:[%s2996_s0 + $0x48] sm:$0xff]   ;;  %v1018_v10 = vld [vmem:[%s2996_s0 + $0x50] sm:$0xff]   ;;  %v1020_v11 = vld [vmem:[%s2996_s0 + $0x58] sm:$0xff]  }
   0x5   :  { %1005 = vst [vmem:[%s2997_s1 + $0x18] sm:$0xff] %v1004_v3   ;;  %v1022_v12 = vld [vmem:[%s2996_s0 + $0x60] sm:$0xff]   ;;  %v1024_v13 = vld [vmem:[%s2996_s0 + $0x68] sm:$0xff]   ;;  %v1026_v14 = vld [vmem:[%s2996_s0 + $0x70] sm:$0xff]  }
   0x6   :  { %1007 = vst [vmem:[%s2997_s1 + $0x20] sm:$0xff] %v1006_v4   ;;  %v1028_v15 = vld [vmem:[%s2996_s0 + $0x78] sm:$0xff]   ;;  %v1030_v16 = vld [vmem:[%s2996_s0 + $0x80] sm:$0xff]   ;;  %v1032_v17 = vld [vmem:[%s2996_s0 + $0x88] sm:$0xff]  }
   0x7   :  { %1009 = vst [vmem:[%s2997_s1 + $0x28] sm:$0xff] %v1008_v5   ;;  %v1034_v18 = vld [vmem:[%s2996_s0 + $0x90] sm:$0xff]   ;;  %v1036_v19 = vld [vmem:[%s2996_s0 + $0x98] sm:$0xff]   ;;  %v1038_v20 = vld [vmem:[%s2996_s0 + $0xa0] sm:$0xff]  }
   0x8   :  { %1011 = vst [vmem:[%s2997_s1 + $0x30] sm:$0xff] %v1010_v6   ;;  %v1040_v21 = vld [vmem:[%s2996_s0 + $0xa8] sm:$0xff]   ;;  %v1042_v22 = vld [vmem:[%s2996_s0 + $0xb0] sm:$0xff]   ;;  %v1044_v23 = vld [vmem:[%s2996_s0 + $0xb8] sm:$0xff]  }
   0x9   :  { %1013 = vst [vmem:[%s2997_s1 + $0x38] sm:$0xff] %v1012_v7   ;;  %v1046_v24 = vld [vmem:[%s2996_s0 + $0xc0] sm:$0xff]   ;;  %v1048_v25 = vld [vmem:[%s2996_s0 + $0xc8] sm:$0xff]   ;;  %v1050_v26 = vld [vmem:[%s2996_s0 + $0xd0] sm:$0xff]  }
   0xa   :  { %1015 = vst [vmem:[%s2997_s1 + $0x40] sm:$0xff] %v1014_v8   ;;  %v1052_v27 = vld [vmem:[%s2996_s0 + $0xd8] sm:$0xff]   ;;  %v1054_v28 = vld [vmem:[%s2996_s0 + $0xe0] sm:$0xff]   ;;  %v1056_v29 = vld [vmem:[%s2996_s0 + $0xe8] sm:$0xff]  }
   0xb   :  { %1017 = vst [vmem:[%s2997_s1 + $0x48] sm:$0xff] %v1016_v9   ;;  %v1058_v30 = vld [vmem:[%s2996_s0 + $0xf0] sm:$0xff]   ;;  %v1060_v31 = vld [vmem:[%s2996_s0 + $0xf8] sm:$0xff]   ;;  %v1062_v32 = vld [vmem:[%s2996_s0 + $0x100] sm:$0xff]  }
   0xc   :  { %1019 = vst [vmem:[%s2997_s1 + $0x50] sm:$0xff] %v1018_v10   ;;  %v1064_v33 = vld [vmem:[%s2996_s0 + $0x108] sm:$0xff]   ;;  %v1066_v34 = vld [vmem:[%s2996_s0 + $0x110] sm:$0xff]   ;;  %v1068_v35 = vld [vmem:[%s2996_s0 + $0x118] sm:$0xff]  }
   0xd   :  { %1021 = vst [vmem:[%s2997_s1 + $0x58] sm:$0xff] %v1020_v11   ;;  %v1070_v36 = vld [vmem:[%s2996_s0 + $0x120] sm:$0xff]   ;;  %v1072_v37 = vld [vmem:[%s2996_s0 + $0x128] sm:$0xff]   ;;  %v1074_v38 = vld [vmem:[%s2996_s0 + $0x130] sm:$0xff]  }
   0xe   :  { %1023 = vst [vmem:[%s2997_s1 + $0x60] sm:$0xff] %v1022_v12   ;;  %v1076_v39 = vld [vmem:[%s2996_s0 + $0x138] sm:$0xff]   ;;  %v1078_v40 = vld [vmem:[%s2996_s0 + $0x140] sm:$0xff]   ;;  %v1080_v41 = vld [vmem:[%s2996_s0 + $0x148] sm:$0xff]  }
   0xf   :  { %1025 = vst [vmem:[%s2997_s1 + $0x68] sm:$0xff] %v1024_v13   ;;  %v1082_v42 = vld [vmem:[%s2996_s0 + $0x150] sm:$0xff]   ;;  %v1084_v43 = vld [vmem:[%s2996_s0 + $0x158] sm:$0xff]   ;;  %v1086_v44 = vld [vmem:[%s2996_s0 + $0x160] sm:$0xff]  }
  0x10   :  { %1027 = vst [vmem:[%s2997_s1 + $0x70] sm:$0xff] %v1026_v14   ;;  %v1088_v45 = vld [vmem:[%s2996_s0 + $0x168] sm:$0xff]   ;;  %v1090_v46 = vld [vmem:[%s2996_s0 + $0x170] sm:$0xff]   ;;  %v1092_v47 = vld [vmem:[%s2996_s0 + $0x178] sm:$0xff]  }
  0x11   :  { %1029 = vst [vmem:[%s2997_s1 + $0x78] sm:$0xff] %v1028_v15   ;;  %v1094_v48 = vld [vmem:[%s2996_s0 + $0x180] sm:$0xff]   ;;  %v1096_v49 = vld [vmem:[%s2996_s0 + $0x188] sm:$0xff]   ;;  %v1098_v50 = vld [vmem:[%s2996_s0 + $0x190] sm:$0xff]  }
  0x12   :  { %1031 = vst [vmem:[%s2997_s1 + $0x80] sm:$0xff] %v1030_v16   ;;  %v1100_v51 = vld [vmem:[%s2996_s0 + $0x198] sm:$0xff]   ;;  %v1102_v52 = vld [vmem:[%s2996_s0 + $0x1a0] sm:$0xff]   ;;  %v1104_v53 = vld [vmem:[%s2996_s0 + $0x1a8] sm:$0xff]  }
  0x13   :  { %1033 = vst [vmem:[%s2997_s1 + $0x88] sm:$0xff] %v1032_v17   ;;  %v1106_v54 = vld [vmem:[%s2996_s0 + $0x1b0] sm:$0xff]   ;;  %v1108_v55 = vld [vmem:[%s2996_s0 + $0x1b8] sm:$0xff]   ;;  %v1110_v56 = vld [vmem:[%s2996_s0 + $0x1c0] sm:$0xff]  }
  0x14   :  { %1035 = vst [vmem:[%s2997_s1 + $0x90] sm:$0xff] %v1034_v18   ;;  %v1112_v57 = vld [vmem:[%s2996_s0 + $0x1c8] sm:$0xff]   ;;  %v1114_v58 = vld [vmem:[%s2996_s0 + $0x1d0] sm:$0xff]   ;;  %v1116_v59 = vld [vmem:[%s2996_s0 + $0x1d8] sm:$0xff]  }
  0x15   :  { %1037 = vst [vmem:[%s2997_s1 + $0x98] sm:$0xff] %v1036_v19   ;;  %v1118_v60 = vld [vmem:[%s2996_s0 + $0x1e0] sm:$0xff]   ;;  %v1120_v61 = vld [vmem:[%s2996_s0 + $0x1e8] sm:$0xff]   ;;  %v1122_v62 = vld [vmem:[%s2996_s0 + $0x1f0] sm:$0xff]  }
  0x16   :  { %1039 = vst [vmem:[%s2997_s1 + $0xa0] sm:$0xff] %v1038_v20   ;;  %v1124_v63 = vld [vmem:[%s2996_s0 + $0x1f8] sm:$0xff]   ;;  %v1126_v0 = vld [vmem:[%s2996_s0 + $0x200] sm:$0xff]   ;;  %v1128_v1 = vld [vmem:[%s2996_s0 + $0x208] sm:$0xff]  }
  0x17   :  { %1041 = vst [vmem:[%s2997_s1 + $0xa8] sm:$0xff] %v1040_v21   ;;  %v1130_v2 = vld [vmem:[%s2996_s0 + $0x210] sm:$0xff]   ;;  %v1132_v3 = vld [vmem:[%s2996_s0 + $0x218] sm:$0xff]   ;;  %v1134_v4 = vld [vmem:[%s2996_s0 + $0x220] sm:$0xff]  }
  0x18   :  { %1043 = vst [vmem:[%s2997_s1 + $0xb0] sm:$0xff] %v1042_v22   ;;  %v1136_v5 = vld [vmem:[%s2996_s0 + $0x228] sm:$0xff]   ;;  %v1138_v6 = vld [vmem:[%s2996_s0 + $0x230] sm:$0xff]   ;;  %v1140_v7 = vld [vmem:[%s2996_s0 + $0x238] sm:$0xff]  }
  0x19   :  { %1045 = vst [vmem:[%s2997_s1 + $0xb8] sm:$0xff] %v1044_v23   ;;  %v1142_v8 = vld [vmem:[%s2996_s0 + $0x240] sm:$0xff]   ;;  %v1144_v9 = vld [vmem:[%s2996_s0 + $0x248] sm:$0xff]   ;;  %v1146_v10 = vld [vmem:[%s2996_s0 + $0x250] sm:$0xff]  }
  0x1a   :  { %1047 = vst [vmem:[%s2997_s1 + $0xc0] sm:$0xff] %v1046_v24   ;;  %v1148_v11 = vld [vmem:[%s2996_s0 + $0x258] sm:$0xff]   ;;  %v1150_v12 = vld [vmem:[%s2996_s0 + $0x260] sm:$0xff]   ;;  %v1152_v13 = vld [vmem:[%s2996_s0 + $0x268] sm:$0xff]  }
  0x1b   :  { %1049 = vst [vmem:[%s2997_s1 + $0xc8] sm:$0xff] %v1048_v25   ;;  %v1154_v14 = vld [vmem:[%s2996_s0 + $0x270] sm:$0xff]   ;;  %v1156_v15 = vld [vmem:[%s2996_s0 + $0x278] sm:$0xff]   ;;  %v1158_v16 = vld [vmem:[%s2996_s0 + $0x280] sm:$0xff]  }
  0x1c   :  { %1051 = vst [vmem:[%s2997_s1 + $0xd0] sm:$0xff] %v1050_v26   ;;  %v1160_v17 = vld [vmem:[%s2996_s0 + $0x288] sm:$0xff]   ;;  %v1162_v18 = vld [vmem:[%s2996_s0 + $0x290] sm:$0xff]   ;;  %v1164_v19 = vld [vmem:[%s2996_s0 + $0x298] sm:$0xff]  }
  0x1d   :  { %1053 = vst [vmem:[%s2997_s1 + $0xd8] sm:$0xff] %v1052_v27   ;;  %v1166_v20 = vld [vmem:[%s2996_s0 + $0x2a0] sm:$0xff]   ;;  %v1168_v21 = vld [vmem:[%s2996_s0 + $0x2a8] sm:$0xff]   ;;  %v1170_v22 = vld [vmem:[%s2996_s0 + $0x2b0] sm:$0xff]  }
  0x1e   :  { %1055 = vst [vmem:[%s2997_s1 + $0xe0] sm:$0xff] %v1054_v28   ;;  %v1172_v23 = vld [vmem:[%s2996_s0 + $0x2b8] sm:$0xff]   ;;  %v1174_v24 = vld [vmem:[%s2996_s0 + $0x2c0] sm:$0xff]   ;;  %v1176_v25 = vld [vmem:[%s2996_s0 + $0x2c8] sm:$0xff]  }
  0x1f   :  { %1057 = vst [vmem:[%s2997_s1 + $0xe8] sm:$0xff] %v1056_v29   ;;  %v1178_v26 = vld [vmem:[%s2996_s0 + $0x2d0] sm:$0xff]   ;;  %v1180_v27 = vld [vmem:[%s2996_s0 + $0x2d8] sm:$0xff]   ;;  %v1182_v28 = vld [vmem:[%s2996_s0 + $0x2e0] sm:$0xff]  }
  0x20   :  { %1059 = vst [vmem:[%s2997_s1 + $0xf0] sm:$0xff] %v1058_v30   ;;  %v1190_v29 = vld [vmem:[%s2996_s0 + $0x300] ss:$8 sm:$0xf]  }
  0x21   :  { %1061 = vst [vmem:[%s2997_s1 + $0xf8] sm:$0xff] %v1060_v31   ;;  %v1184_v30 = vld [vmem:[%s2996_s0 + $0x2e8] sm:$0xff]  }
  0x22   :  { %1063 = vst [vmem:[%s2997_s1 + $0x100] sm:$0xff] %v1062_v32   ;;  %v1191_v31 = vld [vmem:[%s2996_s0 + $0x300] ss:$8 sm:$0xf0]  }
  0x23   :  { %1065 = vst [vmem:[%s2997_s1 + $0x108] sm:$0xff] %v1064_v33   ;;  %v1186_v32 = vld [vmem:[%s2996_s0 + $0x2f0] sm:$0xff]  }
  0x24   :  { %1067 = vst [vmem:[%s2997_s1 + $0x110] sm:$0xff] %v1066_v34   ;;  %v1194_v33 = vld [vmem:[%s2996_s0 + $0x340] ss:$8 sm:$0xf]  }
  0x25   :  { %1069 = vst [vmem:[%s2997_s1 + $0x118] sm:$0xff] %v1068_v35   ;;  %v1188_v34 = vld [vmem:[%s2996_s0 + $0x2f8] sm:$0xff]  }
  0x26   :  { %1071 = vst [vmem:[%s2997_s1 + $0x120] sm:$0xff] %v1070_v36   ;;  %v1195_v35 = vld [vmem:[%s2996_s0 + $0x340] ss:$8 sm:$0xf0]   ;;  %v389_v36 = vsel %vm388_vm0, %v1191_v31, %v1190_v29 }
  0x27   :  { %1073 = vst [vmem:[%s2997_s1 + $0x128] sm:$0xff] %v1072_v37   ;;  %v399_v37 = vsel %vm388_vm0, %v1195_v35, %v1194_v33  ;;  %v1363_v29 = vld [vmem:[%s2996_s0 + $0x538] sm:$0xff]   ;;  %v1369_v31 = vld [vmem:[%s2996_s0 + $0x548] sm:$0xff]  }
  0x28   :  { %1075 = vst [vmem:[%s2997_s1 + $0x130] sm:$0xff] %v1074_v38   ;;  %v1198_v38 = vld [vmem:[%s2996_s0 + $0x380] sm:$0xff]   ;;  %v1375_v33 = vld [vmem:[%s2996_s0 + $0x558] sm:$0xff]   ;;  %v1381_v35 = vld [vmem:[%s2996_s0 + $0x568] sm:$0xff]  }
  0x29   :  { %1077 = vst [vmem:[%s2997_s1 + $0x138] sm:$0xff] %v1076_v39   ;;  %v1201_v39 = vld [vmem:[%s2996_s0 + $0x388] sm:$0xff]  }
  0x2a   :  { %1079 = vst [vmem:[%s2997_s1 + $0x140] sm:$0xff] %v1078_v40   ;;  %v1204_v40 = vld [vmem:[%s2996_s0 + $0x390] sm:$0xff]  }
  0x2b   :  { %1081 = vst [vmem:[%s2997_s1 + $0x148] sm:$0xff] %v1080_v41   ;;  %v1207_v41 = vld [vmem:[%s2996_s0 + $0x398] sm:$0xff]  }
  0x2c   :  { %1083 = vst [vmem:[%s2997_s1 + $0x150] sm:$0xff] %v1082_v42   ;;  %v1210_v42 = vld [vmem:[%s2996_s0 + $0x3a0] sm:$0xff]  }
  0x2d   :  { %1085 = vst [vmem:[%s2997_s1 + $0x158] sm:$0xff] %v1084_v43   ;;  %v1213_v43 = vld [vmem:[%s2996_s0 + $0x3a8] sm:$0xff]  }
  0x2e   :  { %1087 = vst [vmem:[%s2997_s1 + $0x160] sm:$0xff] %v1086_v44   ;;  %v1216_v44 = vld [vmem:[%s2996_s0 + $0x3b0] sm:$0xff]  }
  0x2f   :  { %1089 = vst [vmem:[%s2997_s1 + $0x168] sm:$0xff] %v1088_v45   ;;  %v1219_v45 = vld [vmem:[%s2996_s0 + $0x3b8] sm:$0xff]  }
  0x30   :  { %1091 = vst [vmem:[%s2997_s1 + $0x170] sm:$0xff] %v1090_v46   ;;  %v1222_v46 = vld [vmem:[%s2996_s0 + $0x3c0] sm:$0xff]  }
  0x31   :  { %1093 = vst [vmem:[%s2997_s1 + $0x178] sm:$0xff] %v1092_v47   ;;  %v1225_v47 = vld [vmem:[%s2996_s0 + $0x3c8] sm:$0xff]  }
  0x32   :  { %1095 = vst [vmem:[%s2997_s1 + $0x180] sm:$0xff] %v1094_v48   ;;  %v1228_v48 = vld [vmem:[%s2996_s0 + $0x3d0] sm:$0xff]  }
  0x33   :  { %1097 = vst [vmem:[%s2997_s1 + $0x188] sm:$0xff] %v1096_v49   ;;  %v1231_v49 = vld [vmem:[%s2996_s0 + $0x3d8] sm:$0xff]  }
  0x34   :  { %1099 = vst [vmem:[%s2997_s1 + $0x190] sm:$0xff] %v1098_v50   ;;  %v1234_v50 = vld [vmem:[%s2996_s0 + $0x3e0] sm:$0xff]  }
  0x35   :  { %1101 = vst [vmem:[%s2997_s1 + $0x198] sm:$0xff] %v1100_v51   ;;  %v1237_v51 = vld [vmem:[%s2996_s0 + $0x3e8] sm:$0xff]  }
  0x36   :  { %1103 = vst [vmem:[%s2997_s1 + $0x1a0] sm:$0xff] %v1102_v52   ;;  %v1240_v52 = vld [vmem:[%s2996_s0 + $0x3f0] sm:$0xff]  }
  0x37   :  { %1105 = vst [vmem:[%s2997_s1 + $0x1a8] sm:$0xff] %v1104_v53   ;;  %v1243_v53 = vld [vmem:[%s2996_s0 + $0x3f8] sm:$0xff]  }
  0x38   :  { %1107 = vst [vmem:[%s2997_s1 + $0x1b0] sm:$0xff] %v1106_v54   ;;  %v1246_v54 = vld [vmem:[%s2996_s0 + $0x400] sm:$0xff]  }
  0x39   :  { %1109 = vst [vmem:[%s2997_s1 + $0x1b8] sm:$0xff] %v1108_v55   ;;  %v1249_v55 = vld [vmem:[%s2996_s0 + $0x408] sm:$0xff]  }
  0x3a   :  { %1111 = vst [vmem:[%s2997_s1 + $0x1c0] sm:$0xff] %v1110_v56   ;;  %v1252_v56 = vld [vmem:[%s2996_s0 + $0x410] sm:$0xff]  }
  0x3b   :  { %1113 = vst [vmem:[%s2997_s1 + $0x1c8] sm:$0xff] %v1112_v57   ;;  %v1255_v57 = vld [vmem:[%s2996_s0 + $0x418] sm:$0xff]  }
  0x3c   :  { %1115 = vst [vmem:[%s2997_s1 + $0x1d0] sm:$0xff] %v1114_v58   ;;  %v1258_v58 = vld [vmem:[%s2996_s0 + $0x420] sm:$0xff]  }
  0x3d   :  { %1117 = vst [vmem:[%s2997_s1 + $0x1d8] sm:$0xff] %v1116_v59   ;;  %v1261_v59 = vld [vmem:[%s2996_s0 + $0x428] sm:$0xff]  }
  0x3e   :  { %1119 = vst [vmem:[%s2997_s1 + $0x1e0] sm:$0xff] %v1118_v60   ;;  %v1264_v60 = vld [vmem:[%s2996_s0 + $0x430] sm:$0xff]  }
  0x3f   :  { %1121 = vst [vmem:[%s2997_s1 + $0x1e8] sm:$0xff] %v1120_v61   ;;  %v1267_v61 = vld [vmem:[%s2996_s0 + $0x438] sm:$0xff]  }
  0x40   :  { %1123 = vst [vmem:[%s2997_s1 + $0x1f0] sm:$0xff] %v1122_v62   ;;  %v1270_v62 = vld [vmem:[%s2996_s0 + $0x440] sm:$0xff]  }
  0x41   :  { %1125 = vst [vmem:[%s2997_s1 + $0x1f8] sm:$0xff] %v1124_v63   ;;  %v1273_v63 = vld [vmem:[%s2996_s0 + $0x448] sm:$0xff]  }
  0x42   :  { %1127 = vst [vmem:[%s2997_s1 + $0x200] sm:$0xff] %v1126_v0   ;;  %v1276_v0 = vld [vmem:[%s2996_s0 + $0x450] sm:$0xff]  }
  0x43   :  { %1129 = vst [vmem:[%s2997_s1 + $0x208] sm:$0xff] %v1128_v1   ;;  %v1279_v1 = vld [vmem:[%s2996_s0 + $0x458] sm:$0xff]  }
  0x44   :  { %1131 = vst [vmem:[%s2997_s1 + $0x210] sm:$0xff] %v1130_v2   ;;  %v1282_v2 = vld [vmem:[%s2996_s0 + $0x460] sm:$0xff]  }
  0x45   :  { %1133 = vst [vmem:[%s2997_s1 + $0x218] sm:$0xff] %v1132_v3   ;;  %v1285_v3 = vld [vmem:[%s2996_s0 + $0x468] sm:$0xff]  }
  0x46   :  { %1135 = vst [vmem:[%s2997_s1 + $0x220] sm:$0xff] %v1134_v4   ;;  %v1288_v4 = vld [vmem:[%s2996_s0 + $0x470] sm:$0xff]  }
  0x47   :  { %1137 = vst [vmem:[%s2997_s1 + $0x228] sm:$0xff] %v1136_v5   ;;  %v1291_v5 = vld [vmem:[%s2996_s0 + $0x478] sm:$0xff]  }
  0x48   :  { %1139 = vst [vmem:[%s2997_s1 + $0x230] sm:$0xff] %v1138_v6   ;;  %v1294_v6 = vld [vmem:[%s2996_s0 + $0x480] sm:$0xff]  }
  0x49   :  { %1141 = vst [vmem:[%s2997_s1 + $0x238] sm:$0xff] %v1140_v7   ;;  %v1297_v7 = vld [vmem:[%s2996_s0 + $0x488] sm:$0xff]  }
  0x4a   :  { %1143 = vst [vmem:[%s2997_s1 + $0x240] sm:$0xff] %v1142_v8   ;;  %v1300_v8 = vld [vmem:[%s2996_s0 + $0x490] sm:$0xff]  }
  0x4b   :  { %1145 = vst [vmem:[%s2997_s1 + $0x248] sm:$0xff] %v1144_v9   ;;  %v1303_v9 = vld [vmem:[%s2996_s0 + $0x498] sm:$0xff]  }
  0x4c   :  { %1147 = vst [vmem:[%s2997_s1 + $0x250] sm:$0xff] %v1146_v10   ;;  %v1306_v10 = vld [vmem:[%s2996_s0 + $0x4a0] sm:$0xff]  }
  0x4d   :  { %1149 = vst [vmem:[%s2997_s1 + $0x258] sm:$0xff] %v1148_v11   ;;  %v1309_v11 = vld [vmem:[%s2996_s0 + $0x4a8] sm:$0xff]  }
  0x4e   :  { %1151 = vst [vmem:[%s2997_s1 + $0x260] sm:$0xff] %v1150_v12   ;;  %v1312_v12 = vld [vmem:[%s2996_s0 + $0x4b0] sm:$0xff]  }
  0x4f   :  { %1153 = vst [vmem:[%s2997_s1 + $0x268] sm:$0xff] %v1152_v13   ;;  %v1315_v13 = vld [vmem:[%s2996_s0 + $0x4b8] sm:$0xff]  }
  0x50   :  { %1155 = vst [vmem:[%s2997_s1 + $0x270] sm:$0xff] %v1154_v14   ;;  %v1318_v14 = vld [vmem:[%s2996_s0 + $0x4c0] sm:$0xff]  }
  0x51   :  { %1157 = vst [vmem:[%s2997_s1 + $0x278] sm:$0xff] %v1156_v15   ;;  %v1321_v15 = vld [vmem:[%s2996_s0 + $0x4c8] sm:$0xff]  }
  0x52   :  { %1159 = vst [vmem:[%s2997_s1 + $0x280] sm:$0xff] %v1158_v16   ;;  %v1324_v16 = vld [vmem:[%s2996_s0 + $0x4d0] sm:$0xff]  }
  0x53   :  { %1161 = vst [vmem:[%s2997_s1 + $0x288] sm:$0xff] %v1160_v17   ;;  %v1327_v17 = vld [vmem:[%s2996_s0 + $0x4d8] sm:$0xff]  }
  0x54   :  { %1163 = vst [vmem:[%s2997_s1 + $0x290] sm:$0xff] %v1162_v18   ;;  %v1330_v18 = vld [vmem:[%s2996_s0 + $0x4e0] sm:$0xff]  }
  0x55   :  { %1165 = vst [vmem:[%s2997_s1 + $0x298] sm:$0xff] %v1164_v19   ;;  %v1333_v19 = vld [vmem:[%s2996_s0 + $0x4e8] sm:$0xff]  }
  0x56   :  { %1167 = vst [vmem:[%s2997_s1 + $0x2a0] sm:$0xff] %v1166_v20   ;;  %v1336_v20 = vld [vmem:[%s2996_s0 + $0x4f0] sm:$0xff]  }
  0x57   :  { %1169 = vst [vmem:[%s2997_s1 + $0x2a8] sm:$0xff] %v1168_v21   ;;  %v1339_v21 = vld [vmem:[%s2996_s0 + $0x4f8] sm:$0xff]  }
  0x58   :  { %1171 = vst [vmem:[%s2997_s1 + $0x2b0] sm:$0xff] %v1170_v22   ;;  %v1342_v22 = vld [vmem:[%s2996_s0 + $0x500] sm:$0xff]  }
  0x59   :  { %1173 = vst [vmem:[%s2997_s1 + $0x2b8] sm:$0xff] %v1172_v23   ;;  %v1345_v23 = vld [vmem:[%s2996_s0 + $0x508] sm:$0xff]  }
  0x5a   :  { %1175 = vst [vmem:[%s2997_s1 + $0x2c0] sm:$0xff] %v1174_v24   ;;  %v1348_v24 = vld [vmem:[%s2996_s0 + $0x510] sm:$0xff]  }
  0x5b   :  { %1177 = vst [vmem:[%s2997_s1 + $0x2c8] sm:$0xff] %v1176_v25   ;;  %v1351_v25 = vld [vmem:[%s2996_s0 + $0x518] sm:$0xff]  }
  0x5c   :  { %1179 = vst [vmem:[%s2997_s1 + $0x2d0] sm:$0xff] %v1178_v26   ;;  %v1354_v26 = vld [vmem:[%s2996_s0 + $0x520] sm:$0xff]  }
  0x5d   :  { %1181 = vst [vmem:[%s2997_s1 + $0x2d8] sm:$0xff] %v1180_v27   ;;  %v1357_v27 = vld [vmem:[%s2996_s0 + $0x528] sm:$0xff]  }
  0x5e   :  { %1183 = vst [vmem:[%s2997_s1 + $0x2e0] sm:$0xff] %v1182_v28   ;;  %v1360_v28 = vld [vmem:[%s2996_s0 + $0x530] sm:$0xff]  }
  0x5f   :  { %1185 = vst [vmem:[%s2997_s1 + $0x2e8] sm:$0xff] %v1184_v30   ;;  %v1366_v30 = vld [vmem:[%s2996_s0 + $0x540] sm:$0xff]  }
  0x60   :  { %1187 = vst [vmem:[%s2997_s1 + $0x2f0] sm:$0xff] %v1186_v32   ;;  %v1372_v32 = vld [vmem:[%s2996_s0 + $0x550] sm:$0xff]  }
  0x61   :  { %1189 = vst [vmem:[%s2997_s1 + $0x2f8] sm:$0xff] %v1188_v34   ;;  %v1378_v34 = vld [vmem:[%s2996_s0 + $0x560] sm:$0xff]  }
  0x62   :  { %1192 = vst [vmem:[%s2997_s1 + $0x300] ss:$8 sm:$0xf] %v389_v36  }
  0x63   :  { %1193 = vst [vmem:[%s2997_s1 + $0x300] ss:$8 sm:$0xf0] %v389_v36   ;;  %v1384_v36 = vld [vmem:[%s2996_s0 + $0x570] sm:$0xff]  }
  0x64   :  { %1196 = vst [vmem:[%s2997_s1 + $0x340] ss:$8 sm:$0xf] %v399_v37  }
  0x65   :  { %1197 = vst [vmem:[%s2997_s1 + $0x340] ss:$8 sm:$0xf0] %v399_v37   ;;  %v1387_v37 = vld [vmem:[%s2996_s0 + $0x578] sm:$0xff]  }
  0x66   :  { %1199 = vst [vmem:[%s2997_s1 + $0x301] sm:$0x7f] %v1198_v38  }
  0x67   :  { %1200 = vst [vmem:[%s2997_s1 + $0x379] sm:$0x80] %v1198_v38   ;;  %v1390_v38 = vld [vmem:[%s2996_s0 + $0x580] sm:$0xff]  }
  0x68   :  { %1202 = vst [vmem:[%s2997_s1 + $0x309] sm:$0x7f] %v1201_v39  }
  0x69   :  { %1203 = vst [vmem:[%s2997_s1 + $0x381] sm:$0x80] %v1201_v39   ;;  %v1393_v39 = vld [vmem:[%s2996_s0 + $0x588] sm:$0xff]  }
  0x6a   :  { %1205 = vst [vmem:[%s2997_s1 + $0x311] sm:$0x7f] %v1204_v40  }
  0x6b   :  { %1206 = vst [vmem:[%s2997_s1 + $0x389] sm:$0x80] %v1204_v40   ;;  %v1396_v40 = vld [vmem:[%s2996_s0 + $0x590] sm:$0xff]  }
  0x6c   :  { %1208 = vst [vmem:[%s2997_s1 + $0x319] sm:$0x7f] %v1207_v41  }
  0x6d   :  { %1209 = vst [vmem:[%s2997_s1 + $0x391] sm:$0x80] %v1207_v41   ;;  %v1399_v41 = vld [vmem:[%s2996_s0 + $0x598] sm:$0xff]  }
  0x6e   :  { %1211 = vst [vmem:[%s2997_s1 + $0x321] sm:$0x7f] %v1210_v42  }
  0x6f   :  { %1212 = vst [vmem:[%s2997_s1 + $0x399] sm:$0x80] %v1210_v42   ;;  %v1402_v42 = vld [vmem:[%s2996_s0 + $0x5a0] sm:$0xff]  }
  0x70   :  { %1214 = vst [vmem:[%s2997_s1 + $0x329] sm:$0x7f] %v1213_v43  }
  0x71   :  { %1215 = vst [vmem:[%s2997_s1 + $0x3a1] sm:$0x80] %v1213_v43   ;;  %v1405_v43 = vld [vmem:[%s2996_s0 + $0x5a8] sm:$0xff]  }
  0x72   :  { %1217 = vst [vmem:[%s2997_s1 + $0x331] sm:$0x7f] %v1216_v44  }
  0x73   :  { %1218 = vst [vmem:[%s2997_s1 + $0x3a9] sm:$0x80] %v1216_v44   ;;  %v1408_v44 = vld [vmem:[%s2996_s0 + $0x5b0] sm:$0xff]  }
  0x74   :  { %1220 = vst [vmem:[%s2997_s1 + $0x339] sm:$0x7f] %v1219_v45  }
  0x75   :  { %1221 = vst [vmem:[%s2997_s1 + $0x3b1] sm:$0x80] %v1219_v45   ;;  %v1411_v45 = vld [vmem:[%s2996_s0 + $0x5b8] sm:$0xff]  }
  0x76   :  { %1223 = vst [vmem:[%s2997_s1 + $0x341] sm:$0x7f] %v1222_v46  }
  0x77   :  { %1224 = vst [vmem:[%s2997_s1 + $0x3b9] sm:$0x80] %v1222_v46   ;;  %v1414_v46 = vld [vmem:[%s2996_s0 + $0x5c0] sm:$0xff]  }
  0x78   :  { %1226 = vst [vmem:[%s2997_s1 + $0x349] sm:$0x7f] %v1225_v47  }
  0x79   :  { %1227 = vst [vmem:[%s2997_s1 + $0x3c1] sm:$0x80] %v1225_v47   ;;  %v1417_v47 = vld [vmem:[%s2996_s0 + $0x5c8] sm:$0xff]  }
  0x7a   :  { %1229 = vst [vmem:[%s2997_s1 + $0x351] sm:$0x7f] %v1228_v48  }
  0x7b   :  { %1230 = vst [vmem:[%s2997_s1 + $0x3c9] sm:$0x80] %v1228_v48   ;;  %v1420_v48 = vld [vmem:[%s2996_s0 + $0x5d0] sm:$0xff]  }
  0x7c   :  { %1232 = vst [vmem:[%s2997_s1 + $0x359] sm:$0x7f] %v1231_v49  }
  0x7d   :  { %1233 = vst [vmem:[%s2997_s1 + $0x3d1] sm:$0x80] %v1231_v49   ;;  %v1423_v49 = vld [vmem:[%s2996_s0 + $0x5d8] sm:$0xff]  }
  0x7e   :  { %1235 = vst [vmem:[%s2997_s1 + $0x361] sm:$0x7f] %v1234_v50  }
  0x7f   :  { %1236 = vst [vmem:[%s2997_s1 + $0x3d9] sm:$0x80] %v1234_v50   ;;  %v1426_v50 = vld [vmem:[%s2996_s0 + $0x5e0] sm:$0xff]  }
  0x80   :  { %1238 = vst [vmem:[%s2997_s1 + $0x369] sm:$0x7f] %v1237_v51  }
  0x81   :  { %1239 = vst [vmem:[%s2997_s1 + $0x3e1] sm:$0x80] %v1237_v51   ;;  %v1429_v51 = vld [vmem:[%s2996_s0 + $0x5e8] sm:$0xff]  }
  0x82   :  { %1241 = vst [vmem:[%s2997_s1 + $0x371] sm:$0x7f] %v1240_v52  }
  0x83   :  { %1242 = vst [vmem:[%s2997_s1 + $0x3e9] sm:$0x80] %v1240_v52   ;;  %v1432_v52 = vld [vmem:[%s2996_s0 + $0x5f0] sm:$0xff]  }
  0x84   :  { %1244 = vst [vmem:[%s2997_s1 + $0x379] sm:$0x7f] %v1243_v53  }
  0x85   :  { %1245 = vst [vmem:[%s2997_s1 + $0x3f1] sm:$0x80] %v1243_v53   ;;  %v1435_v53 = vld [vmem:[%s2996_s0 + $0x5f8] sm:$0xff]  }
  0x86   :  { %1247 = vst [vmem:[%s2997_s1 + $0x381] sm:$0x7f] %v1246_v54  }
  0x87   :  { %1248 = vst [vmem:[%s2997_s1 + $0x3f9] sm:$0x80] %v1246_v54   ;;  %v1438_v54 = vld [vmem:[%s2996_s0 + $0x600] sm:$0xff]  }
  0x88   :  { %1250 = vst [vmem:[%s2997_s1 + $0x389] sm:$0x7f] %v1249_v55  }
  0x89   :  { %1251 = vst [vmem:[%s2997_s1 + $0x401] sm:$0x80] %v1249_v55   ;;  %v1441_v55 = vld [vmem:[%s2996_s0 + $0x608] sm:$0xff]  }
  0x8a   :  { %1253 = vst [vmem:[%s2997_s1 + $0x391] sm:$0x7f] %v1252_v56  }
  0x8b   :  { %1254 = vst [vmem:[%s2997_s1 + $0x409] sm:$0x80] %v1252_v56   ;;  %v1444_v56 = vld [vmem:[%s2996_s0 + $0x610] sm:$0xff]  }
  0x8c   :  { %1256 = vst [vmem:[%s2997_s1 + $0x399] sm:$0x7f] %v1255_v57  }
  0x8d   :  { %1257 = vst [vmem:[%s2997_s1 + $0x411] sm:$0x80] %v1255_v57   ;;  %v1447_v57 = vld [vmem:[%s2996_s0 + $0x618] sm:$0xff]  }
  0x8e   :  { %1259 = vst [vmem:[%s2997_s1 + $0x3a1] sm:$0x7f] %v1258_v58  }
  0x8f   :  { %1260 = vst [vmem:[%s2997_s1 + $0x419] sm:$0x80] %v1258_v58   ;;  %v1450_v58 = vld [vmem:[%s2996_s0 + $0x620] sm:$0xff]  }
  0x90   :  { %1262 = vst [vmem:[%s2997_s1 + $0x3a9] sm:$0x7f] %v1261_v59  }
  0x91   :  { %1263 = vst [vmem:[%s2997_s1 + $0x421] sm:$0x80] %v1261_v59   ;;  %v1453_v59 = vld [vmem:[%s2996_s0 + $0x628] sm:$0xff]  }
  0x92   :  { %1265 = vst [vmem:[%s2997_s1 + $0x3b1] sm:$0x7f] %v1264_v60  }
  0x93   :  { %1266 = vst [vmem:[%s2997_s1 + $0x429] sm:$0x80] %v1264_v60   ;;  %v1456_v60 = vld [vmem:[%s2996_s0 + $0x630] sm:$0xff]  }
  0x94   :  { %1268 = vst [vmem:[%s2997_s1 + $0x3b9] sm:$0x7f] %v1267_v61  }
  0x95   :  { %1269 = vst [vmem:[%s2997_s1 + $0x431] sm:$0x80] %v1267_v61   ;;  %v1459_v61 = vld [vmem:[%s2996_s0 + $0x638] sm:$0xff]  }
  0x96   :  { %1271 = vst [vmem:[%s2997_s1 + $0x3c1] sm:$0x7f] %v1270_v62  }
  0x97   :  { %1272 = vst [vmem:[%s2997_s1 + $0x439] sm:$0x80] %v1270_v62   ;;  %v1462_v62 = vld [vmem:[%s2996_s0 + $0x640] sm:$0xff]  }
  0x98   :  { %1274 = vst [vmem:[%s2997_s1 + $0x3c9] sm:$0x7f] %v1273_v63  }
  0x99   :  { %1275 = vst [vmem:[%s2997_s1 + $0x441] sm:$0x80] %v1273_v63   ;;  %v1465_v63 = vld [vmem:[%s2996_s0 + $0x648] sm:$0xff]  }
  0x9a   :  { %1277 = vst [vmem:[%s2997_s1 + $0x3d1] sm:$0x7f] %v1276_v0  }
  0x9b   :  { %1278 = vst [vmem:[%s2997_s1 + $0x449] sm:$0x80] %v1276_v0   ;;  %v1468_v0 = vld [vmem:[%s2996_s0 + $0x650] sm:$0xff]  }
  0x9c   :  { %1280 = vst [vmem:[%s2997_s1 + $0x3d9] sm:$0x7f] %v1279_v1  }
  0x9d   :  { %1281 = vst [vmem:[%s2997_s1 + $0x451] sm:$0x80] %v1279_v1   ;;  %v1471_v1 = vld [vmem:[%s2996_s0 + $0x658] sm:$0xff]  }
  0x9e   :  { %1283 = vst [vmem:[%s2997_s1 + $0x3e1] sm:$0x7f] %v1282_v2  }
  0x9f   :  { %1284 = vst [vmem:[%s2997_s1 + $0x459] sm:$0x80] %v1282_v2   ;;  %v1474_v2 = vld [vmem:[%s2996_s0 + $0x660] sm:$0xff]  }
  0xa0   :  { %1286 = vst [vmem:[%s2997_s1 + $0x3e9] sm:$0x7f] %v1285_v3  }
  0xa1   :  { %1287 = vst [vmem:[%s2997_s1 + $0x461] sm:$0x80] %v1285_v3   ;;  %v1477_v3 = vld [vmem:[%s2996_s0 + $0x668] sm:$0xff]  }
  0xa2   :  { %1289 = vst [vmem:[%s2997_s1 + $0x3f1] sm:$0x7f] %v1288_v4  }
  0xa3   :  { %1290 = vst [vmem:[%s2997_s1 + $0x469] sm:$0x80] %v1288_v4   ;;  %v1480_v4 = vld [vmem:[%s2996_s0 + $0x670] sm:$0xff]  }
  0xa4   :  { %1292 = vst [vmem:[%s2997_s1 + $0x3f9] sm:$0x7f] %v1291_v5  }
  0xa5   :  { %1293 = vst [vmem:[%s2997_s1 + $0x471] sm:$0x80] %v1291_v5   ;;  %v1486_v5 = vld [vmem:[%s2996_s0 + $0x680] ss:$8 sm:$0xf]  }
  0xa6   :  { %1295 = vst [vmem:[%s2997_s1 + $0x401] sm:$0x7f] %v1294_v6  }
  0xa7   :  { %1296 = vst [vmem:[%s2997_s1 + $0x479] sm:$0x80] %v1294_v6   ;;  %v1487_v6 = vld [vmem:[%s2996_s0 + $0x680] ss:$8 sm:$0xf0]  }
  0xa8   :  { %1298 = vst [vmem:[%s2997_s1 + $0x409] sm:$0x7f] %v1297_v7  }
  0xa9   :  { %1299 = vst [vmem:[%s2997_s1 + $0x481] sm:$0x80] %v1297_v7   ;;  %v1483_v7 = vld [vmem:[%s2996_s0 + $0x678] sm:$0xff]  }
  0xaa   :  { %1301 = vst [vmem:[%s2997_s1 + $0x411] sm:$0x7f] %v1300_v8  }
  0xab   :  { %1302 = vst [vmem:[%s2997_s1 + $0x489] sm:$0x80] %v1300_v8   ;;  %v1490_v8 = vld [vmem:[%s2996_s0 + $0x6c0] ss:$8 sm:$0xf]  }
  0xac   :  { %1304 = vst [vmem:[%s2997_s1 + $0x419] sm:$0x7f] %v1303_v9  }
  0xad   :  { %1305 = vst [vmem:[%s2997_s1 + $0x491] sm:$0x80] %v1303_v9   ;;  %v1491_v9 = vld [vmem:[%s2996_s0 + $0x6c0] ss:$8 sm:$0xf0]  }
  0xae   :  { %1307 = vst [vmem:[%s2997_s1 + $0x421] sm:$0x7f] %v1306_v10  }
  0xaf   :  { %1308 = vst [vmem:[%s2997_s1 + $0x499] sm:$0x80] %v1306_v10   ;;  %v985_v10 = vsel %vm388_vm0, %v1487_v6, %v1486_v5 }
  0xb0   :  { %1310 = vst [vmem:[%s2997_s1 + $0x429] sm:$0x7f] %v1309_v11  }
  0xb1   :  { %1311 = vst [vmem:[%s2997_s1 + $0x4a1] sm:$0x80] %v1309_v11   ;;  %v995_v11 = vsel %vm388_vm0, %v1491_v9, %v1490_v8 }
  0xb2   :  { %1313 = vst [vmem:[%s2997_s1 + $0x431] sm:$0x7f] %v1312_v12  }
  0xb3   :  { %1314 = vst [vmem:[%s2997_s1 + $0x4a9] sm:$0x80] %v1312_v12  }
  0xb4   :  { %1316 = vst [vmem:[%s2997_s1 + $0x439] sm:$0x7f] %v1315_v13  }
  0xb5   :  { %1317 = vst [vmem:[%s2997_s1 + $0x4b1] sm:$0x80] %v1315_v13  }
  0xb6   :  { %1319 = vst [vmem:[%s2997_s1 + $0x441] sm:$0x7f] %v1318_v14  }
  0xb7   :  { %1320 = vst [vmem:[%s2997_s1 + $0x4b9] sm:$0x80] %v1318_v14  }
  0xb8   :  { %1322 = vst [vmem:[%s2997_s1 + $0x449] sm:$0x7f] %v1321_v15  }
  0xb9   :  { %1323 = vst [vmem:[%s2997_s1 + $0x4c1] sm:$0x80] %v1321_v15  }
  0xba   :  { %1325 = vst [vmem:[%s2997_s1 + $0x451] sm:$0x7f] %v1324_v16  }
  0xbb   :  { %1326 = vst [vmem:[%s2997_s1 + $0x4c9] sm:$0x80] %v1324_v16  }
  0xbc   :  { %1328 = vst [vmem:[%s2997_s1 + $0x459] sm:$0x7f] %v1327_v17  }
  0xbd   :  { %1329 = vst [vmem:[%s2997_s1 + $0x4d1] sm:$0x80] %v1327_v17  }
  0xbe   :  { %1331 = vst [vmem:[%s2997_s1 + $0x461] sm:$0x7f] %v1330_v18  }
  0xbf   :  { %1332 = vst [vmem:[%s2997_s1 + $0x4d9] sm:$0x80] %v1330_v18  }
  0xc0   :  { %1334 = vst [vmem:[%s2997_s1 + $0x469] sm:$0x7f] %v1333_v19  }
  0xc1   :  { %1335 = vst [vmem:[%s2997_s1 + $0x4e1] sm:$0x80] %v1333_v19  }
  0xc2   :  { %1337 = vst [vmem:[%s2997_s1 + $0x471] sm:$0x7f] %v1336_v20  }
  0xc3   :  { %1338 = vst [vmem:[%s2997_s1 + $0x4e9] sm:$0x80] %v1336_v20  }
  0xc4   :  { %1340 = vst [vmem:[%s2997_s1 + $0x479] sm:$0x7f] %v1339_v21  }
  0xc5   :  { %1341 = vst [vmem:[%s2997_s1 + $0x4f1] sm:$0x80] %v1339_v21  }
  0xc6   :  { %1343 = vst [vmem:[%s2997_s1 + $0x481] sm:$0x7f] %v1342_v22  }
  0xc7   :  { %1344 = vst [vmem:[%s2997_s1 + $0x4f9] sm:$0x80] %v1342_v22  }
  0xc8   :  { %1346 = vst [vmem:[%s2997_s1 + $0x489] sm:$0x7f] %v1345_v23  }
  0xc9   :  { %1347 = vst [vmem:[%s2997_s1 + $0x501] sm:$0x80] %v1345_v23  }
  0xca   :  { %1349 = vst [vmem:[%s2997_s1 + $0x491] sm:$0x7f] %v1348_v24  }
  0xcb   :  { %1350 = vst [vmem:[%s2997_s1 + $0x509] sm:$0x80] %v1348_v24  }
  0xcc   :  { %1352 = vst [vmem:[%s2997_s1 + $0x499] sm:$0x7f] %v1351_v25  }
  0xcd   :  { %1353 = vst [vmem:[%s2997_s1 + $0x511] sm:$0x80] %v1351_v25  }
  0xce   :  { %1355 = vst [vmem:[%s2997_s1 + $0x4a1] sm:$0x7f] %v1354_v26  }
  0xcf   :  { %1356 = vst [vmem:[%s2997_s1 + $0x519] sm:$0x80] %v1354_v26  }
  0xd0   :  { %1358 = vst [vmem:[%s2997_s1 + $0x4a9] sm:$0x7f] %v1357_v27  }
  0xd1   :  { %1359 = vst [vmem:[%s2997_s1 + $0x521] sm:$0x80] %v1357_v27  }
  0xd2   :  { %1361 = vst [vmem:[%s2997_s1 + $0x4b1] sm:$0x7f] %v1360_v28  }
  0xd3   :  { %1362 = vst [vmem:[%s2997_s1 + $0x529] sm:$0x80] %v1360_v28  }
  0xd4   :  { %1364 = vst [vmem:[%s2997_s1 + $0x4b9] sm:$0x7f] %v1363_v29  }
  0xd5   :  { %1365 = vst [vmem:[%s2997_s1 + $0x531] sm:$0x80] %v1363_v29  }
  0xd6   :  { %1367 = vst [vmem:[%s2997_s1 + $0x4c1] sm:$0x7f] %v1366_v30  }
  0xd7   :  { %1368 = vst [vmem:[%s2997_s1 + $0x539] sm:$0x80] %v1366_v30  }
  0xd8   :  { %1370 = vst [vmem:[%s2997_s1 + $0x4c9] sm:$0x7f] %v1369_v31  }
  0xd9   :  { %1371 = vst [vmem:[%s2997_s1 + $0x541] sm:$0x80] %v1369_v31  }
  0xda   :  { %1373 = vst [vmem:[%s2997_s1 + $0x4d1] sm:$0x7f] %v1372_v32  }
  0xdb   :  { %1374 = vst [vmem:[%s2997_s1 + $0x549] sm:$0x80] %v1372_v32  }
  0xdc   :  { %1376 = vst [vmem:[%s2997_s1 + $0x4d9] sm:$0x7f] %v1375_v33  }
  0xdd   :  { %1377 = vst [vmem:[%s2997_s1 + $0x551] sm:$0x80] %v1375_v33  }
  0xde   :  { %1379 = vst [vmem:[%s2997_s1 + $0x4e1] sm:$0x7f] %v1378_v34  }
  0xdf   :  { %1380 = vst [vmem:[%s2997_s1 + $0x559] sm:$0x80] %v1378_v34  }
  0xe0   :  { %1382 = vst [vmem:[%s2997_s1 + $0x4e9] sm:$0x7f] %v1381_v35  }
  0xe1   :  { %1383 = vst [vmem:[%s2997_s1 + $0x561] sm:$0x80] %v1381_v35  }
  0xe2   :  { %1385 = vst [vmem:[%s2997_s1 + $0x4f1] sm:$0x7f] %v1384_v36  }
  0xe3   :  { %1386 = vst [vmem:[%s2997_s1 + $0x569] sm:$0x80] %v1384_v36  }
  0xe4   :  { %1388 = vst [vmem:[%s2997_s1 + $0x4f9] sm:$0x7f] %v1387_v37  }
  0xe5   :  { %1389 = vst [vmem:[%s2997_s1 + $0x571] sm:$0x80] %v1387_v37  }
  0xe6   :  { %1391 = vst [vmem:[%s2997_s1 + $0x501] sm:$0x7f] %v1390_v38  }
  0xe7   :  { %1392 = vst [vmem:[%s2997_s1 + $0x579] sm:$0x80] %v1390_v38  }
  0xe8   :  { %1394 = vst [vmem:[%s2997_s1 + $0x509] sm:$0x7f] %v1393_v39  }
  0xe9   :  { %1395 = vst [vmem:[%s2997_s1 + $0x581] sm:$0x80] %v1393_v39  }
  0xea   :  { %1397 = vst [vmem:[%s2997_s1 + $0x511] sm:$0x7f] %v1396_v40  }
  0xeb   :  { %1398 = vst [vmem:[%s2997_s1 + $0x589] sm:$0x80] %v1396_v40  }
  0xec   :  { %1400 = vst [vmem:[%s2997_s1 + $0x519] sm:$0x7f] %v1399_v41  }
  0xed   :  { %1401 = vst [vmem:[%s2997_s1 + $0x591] sm:$0x80] %v1399_v41  }
  0xee   :  { %1403 = vst [vmem:[%s2997_s1 + $0x521] sm:$0x7f] %v1402_v42  }
  0xef   :  { %1404 = vst [vmem:[%s2997_s1 + $0x599] sm:$0x80] %v1402_v42  }
  0xf0   :  { %1406 = vst [vmem:[%s2997_s1 + $0x529] sm:$0x7f] %v1405_v43  }
  0xf1   :  { %1407 = vst [vmem:[%s2997_s1 + $0x5a1] sm:$0x80] %v1405_v43  }
  0xf2   :  { %1409 = vst [vmem:[%s2997_s1 + $0x531] sm:$0x7f] %v1408_v44  }
  0xf3   :  { %1410 = vst [vmem:[%s2997_s1 + $0x5a9] sm:$0x80] %v1408_v44  }
  0xf4   :  { %1412 = vst [vmem:[%s2997_s1 + $0x539] sm:$0x7f] %v1411_v45  }
  0xf5   :  { %1413 = vst [vmem:[%s2997_s1 + $0x5b1] sm:$0x80] %v1411_v45  }
  0xf6   :  { %1415 = vst [vmem:[%s2997_s1 + $0x541] sm:$0x7f] %v1414_v46  }
  0xf7   :  { %1416 = vst [vmem:[%s2997_s1 + $0x5b9] sm:$0x80] %v1414_v46  }
  0xf8   :  { %1418 = vst [vmem:[%s2997_s1 + $0x549] sm:$0x7f] %v1417_v47  }
  0xf9   :  { %1419 = vst [vmem:[%s2997_s1 + $0x5c1] sm:$0x80] %v1417_v47  }
  0xfa   :  { %1421 = vst [vmem:[%s2997_s1 + $0x551] sm:$0x7f] %v1420_v48  }
  0xfb   :  { %1422 = vst [vmem:[%s2997_s1 + $0x5c9] sm:$0x80] %v1420_v48  }
  0xfc   :  { %1424 = vst [vmem:[%s2997_s1 + $0x559] sm:$0x7f] %v1423_v49  }
  0xfd   :  { %1425 = vst [vmem:[%s2997_s1 + $0x5d1] sm:$0x80] %v1423_v49  }
  0xfe   :  { %1427 = vst [vmem:[%s2997_s1 + $0x561] sm:$0x7f] %v1426_v50  }
  0xff   :  { %1428 = vst [vmem:[%s2997_s1 + $0x5d9] sm:$0x80] %v1426_v50  }
 0x100   :  { %1430 = vst [vmem:[%s2997_s1 + $0x569] sm:$0x7f] %v1429_v51  }
 0x101   :  { %1431 = vst [vmem:[%s2997_s1 + $0x5e1] sm:$0x80] %v1429_v51  }
 0x102   :  { %1433 = vst [vmem:[%s2997_s1 + $0x571] sm:$0x7f] %v1432_v52  }
 0x103   :  { %1434 = vst [vmem:[%s2997_s1 + $0x5e9] sm:$0x80] %v1432_v52  }
 0x104   :  { %1436 = vst [vmem:[%s2997_s1 + $0x579] sm:$0x7f] %v1435_v53  }
 0x105   :  { %1437 = vst [vmem:[%s2997_s1 + $0x5f1] sm:$0x80] %v1435_v53  }
 0x106   :  { %1439 = vst [vmem:[%s2997_s1 + $0x581] sm:$0x7f] %v1438_v54  }
 0x107   :  { %1440 = vst [vmem:[%s2997_s1 + $0x5f9] sm:$0x80] %v1438_v54  }
 0x108   :  { %1442 = vst [vmem:[%s2997_s1 + $0x589] sm:$0x7f] %v1441_v55  }
 0x109   :  { %1443 = vst [vmem:[%s2997_s1 + $0x601] sm:$0x80] %v1441_v55  }
 0x10a   :  { %1445 = vst [vmem:[%s2997_s1 + $0x591] sm:$0x7f] %v1444_v56  }
 0x10b   :  { %1446 = vst [vmem:[%s2997_s1 + $0x609] sm:$0x80] %v1444_v56  }
 0x10c   :  { %1448 = vst [vmem:[%s2997_s1 + $0x599] sm:$0x7f] %v1447_v57  }
 0x10d   :  { %1449 = vst [vmem:[%s2997_s1 + $0x611] sm:$0x80] %v1447_v57  }
 0x10e   :  { %1451 = vst [vmem:[%s2997_s1 + $0x5a1] sm:$0x7f] %v1450_v58  }
 0x10f   :  { %1452 = vst [vmem:[%s2997_s1 + $0x619] sm:$0x80] %v1450_v58  }
 0x110   :  { %1454 = vst [vmem:[%s2997_s1 + $0x5a9] sm:$0x7f] %v1453_v59  }
 0x111   :  { %1455 = vst [vmem:[%s2997_s1 + $0x621] sm:$0x80] %v1453_v59  }
 0x112   :  { %1457 = vst [vmem:[%s2997_s1 + $0x5b1] sm:$0x7f] %v1456_v60  }
 0x113   :  { %1458 = vst [vmem:[%s2997_s1 + $0x629] sm:$0x80] %v1456_v60  }
 0x114   :  { %1460 = vst [vmem:[%s2997_s1 + $0x5b9] sm:$0x7f] %v1459_v61  }
 0x115   :  { %1461 = vst [vmem:[%s2997_s1 + $0x631] sm:$0x80] %v1459_v61  }
 0x116   :  { %1463 = vst [vmem:[%s2997_s1 + $0x5c1] sm:$0x7f] %v1462_v62  }
 0x117   :  { %1464 = vst [vmem:[%s2997_s1 + $0x639] sm:$0x80] %v1462_v62  }
 0x118   :  { %1466 = vst [vmem:[%s2997_s1 + $0x5c9] sm:$0x7f] %v1465_v63  }
 0x119   :  { %1467 = vst [vmem:[%s2997_s1 + $0x641] sm:$0x80] %v1465_v63  }
 0x11a   :  { %1469 = vst [vmem:[%s2997_s1 + $0x5d1] sm:$0x7f] %v1468_v0  }
 0x11b   :  { %1470 = vst [vmem:[%s2997_s1 + $0x649] sm:$0x80] %v1468_v0  }
 0x11c   :  { %1472 = vst [vmem:[%s2997_s1 + $0x5d9] sm:$0x7f] %v1471_v1  }
 0x11d   :  { %1473 = vst [vmem:[%s2997_s1 + $0x651] sm:$0x80] %v1471_v1  }
 0x11e   :  { %1475 = vst [vmem:[%s2997_s1 + $0x5e1] sm:$0x7f] %v1474_v2  }
 0x11f   :  { %1476 = vst [vmem:[%s2997_s1 + $0x659] sm:$0x80] %v1474_v2  }
 0x120   :  { %1478 = vst [vmem:[%s2997_s1 + $0x5e9] sm:$0x7f] %v1477_v3  }
 0x121   :  { %1479 = vst [vmem:[%s2997_s1 + $0x661] sm:$0x80] %v1477_v3  }
 0x122   :  { %1481 = vst [vmem:[%s2997_s1 + $0x5f1] sm:$0x7f] %v1480_v4  }
 0x123   :  { %1482 = vst [vmem:[%s2997_s1 + $0x669] sm:$0x80] %v1480_v4  }
 0x124   :  { %1484 = vst [vmem:[%s2997_s1 + $0x5f9] sm:$0x7f] %v1483_v7  }
 0x125   :  { %1485 = vst [vmem:[%s2997_s1 + $0x671] sm:$0x80] %v1483_v7  }
 0x126   :  { %1488 = vst [vmem:[%s2997_s1 + $0x601] ss:$8 sm:$0xf] %v985_v10  }
 0x127   :  { %1489 = vst [vmem:[%s2997_s1 + $0x601] ss:$8 sm:$0xf0] %v985_v10  }
 0x128   :  { %1492 = vst [vmem:[%s2997_s1 + $0x641] ss:$8 sm:$0xf] %v995_v11  }
 0x129   :  { %1493 = vst [vmem:[%s2997_s1 + $0x641] ss:$8 sm:$0xf0] %v995_v11  }

</bundles_post_ra>
